<compile_context>
chip_gen: v6e
topology: v6e:2x2x1
jax: 0.10.0
libtpu: 0.0.40
codegen_flags: <defaults>
</compile_context>

<pallas_src>
import jax
import jax.numpy as jnp
import numpy as np
from jax.experimental import pallas as pl
from jax.experimental.pallas import tpu as pltpu

BN_EPS = 1e-5
VMEM_BUDGET = 44 * 1024 * 1024   # per-step tile footprint target (v7x: 64 MiB physical)
VMEM_CAP = 56 * 1024 * 1024      # never ask the compiler for more than this


def _round_up(x, m):
    return (x + m - 1) // m * m


def _pad2d(a, rows, cols):
    return jnp.pad(a, ((0, rows - a.shape[0]), (0, cols - a.shape[1])))


# -----------------------------------------------------------------------------
# VMEM budgeting / row-tile selection
# -----------------------------------------------------------------------------
def _vmem_bytes(tm, k_pad, c_pad):
    """Rough double-buffered footprint of one matmul+stats grid step (bytes)."""
    bf16, f32 = 2, 4
    patches = 2 * tm * k_pad * bf16      # double-buffered input tile
    weight = 2 * k_pad * c_pad * bf16    # constant block (Pallas still double-buffers)
    y_out = 2 * tm * c_pad * bf16        # double-buffered output tile
    stats = 2 * 2 * 8 * c_pad * f32      # resident sum / sumsq accumulators
    rows = 2 * 2 * c_pad * f32           # scale / shift rows
    return patches + weight + y_out + stats + rows


def _vmem_limit(tm, k_pad, c_pad):
    est = _vmem_bytes(tm, k_pad, c_pad)
    return int(min(max(est * 5 // 4 + (4 << 20), 32 << 20), VMEM_CAP))


def _pick_tile(m, k_pad, c_pad):
    """Row tile (multiple of 8) minimizing zero-row padding under the VMEM
    budget, preferring larger tiles (amortize ~0.35us/grid-step overhead)."""
    m8 = _round_up(m, 8)
    cands = []
    if m8 <= 1024:
        cands.append(m8)                 # single tile, zero padded rows
    cands += [t for t in (1024, 768, 512, 384, 256, 128, 64, 32, 16, 8) if t <= m8]
    best = None
    for tm in cands:
        if _vmem_bytes(tm, k_pad, c_pad) > VMEM_BUDGET:
            continue
        m_pad = _round_up(m8, tm)
        score = (m_pad, -tm)             # least padding first, then biggest tile
        if best is None or score < best[0]:
            best = (score, tm, m_pad)
    if best is None:                     # extreme fallback (huge K*C)
        return 8, _round_up(m8, 8)
    return best[1], best[2]


# -----------------------------------------------------------------------------
# Pallas kernels
# -----------------------------------------------------------------------------
def _stats_y_kernel(p_ref, w_ref, y_ref, sum_ref, sq_ref):
    """Phase 1 (3x3 convs): y = patches @ w; write pre-BN y (bf16) and
    accumulate per-column sum / sum-of-squares into resident (8, C) blocks."""
    @pl.when(pl.program_id(0) == 0)
    def _():
        sum_ref[...] = jnp.zeros_like(sum_ref)
        sq_ref[...] = jnp.zeros_like(sq_ref)

    y = jnp.dot(p_ref[...], w_ref[...], preferred_element_type=jnp.float32)
    y_ref[...] = y.astype(y_ref.dtype)
    tm, c = y.shape
    yr = y.reshape(tm // 8, 8, c)        # sublane-aligned partial reduce
    sum_ref[...] += jnp.sum(yr, axis=0)
    sq_ref[...] += jnp.sum(yr * yr, axis=0)


def _stats_kernel(p_ref, w_ref, sum_ref, sq_ref):
    """Phase 1 (ConvT, recompute path): statistics only, no y writeback."""
    @pl.when(pl.program_id(0) == 0)
    def _():
        sum_ref[...] = jnp.zeros_like(sum_ref)
        sq_ref[...] = jnp.zeros_like(sq_ref)

    y = jnp.dot(p_ref[...], w_ref[...], preferred_element_type=jnp.float32)
    tm, c = y.shape
    yr = y.reshape(tm // 8, 8, c)
    sum_ref[...] += jnp.sum(yr, axis=0)
    sq_ref[...] += jnp.sum(yr * yr, axis=0)


def _bn_relu_kernel(y_ref, scale_ref, shift_ref, o_ref):
    """Phase 2 (3x3 convs): pure elementwise  max(y*scale + shift, 0)."""
    y = y_ref[...].astype(jnp.float32)
    o_ref[...] = jnp.maximum(y * scale_ref[...] + shift_ref[...], 0.0).astype(o_ref.dtype)


def _apply_recompute_kernel(p_ref, w_ref, scale_ref, shift_ref, o_ref):
    """Phase 2 (ConvT): recompute the cheap (K_pad < 2*C_pad) matmul, fold BN + ReLU."""
    y = jnp.dot(p_ref[...], w_ref[...], preferred_element_type=jnp.float32)
    o_ref[...] = jnp.maximum(y * scale_ref[...] + shift_ref[...], 0.0).astype(o_ref.dtype)


# -----------------------------------------------------------------------------
# pallas_call wrappers
# -----------------------------------------------------------------------------
def _call_stats_y(patches_p, w_p, tm, vmem_limit):
    m_pad, k_pad = patches_p.shape
    c_pad = w_p.shape[1]
    grid_m = m_pad // tm
    return pl.pallas_call(
        _stats_y_kernel,
        out_shape=(jax.ShapeDtypeStruct((m_pad, c_pad), jnp.bfloat16),
                   jax.ShapeDtypeStruct((8, c_pad), jnp.float32),
                   jax.ShapeDtypeStruct((8, c_pad), jnp.float32)),
        grid_spec=pltpu.PrefetchScalarGridSpec(
            num_scalar_prefetch=0,
            grid=(grid_m,),
            in_specs=[pl.BlockSpec((tm, k_pad), lambda i: (i, 0)),
                      pl.BlockSpec((k_pad, c_pad), lambda i: (0, 0))],
            out_specs=[pl.BlockSpec((tm, c_pad), lambda i: (i, 0)),
                       pl.BlockSpec((8, c_pad), lambda i: (0, 0)),
                       pl.BlockSpec((8, c_pad), lambda i: (0, 0))]),
        compiler_params=pltpu.CompilerParams(
            dimension_semantics=("arbitrary",),
            vmem_limit_bytes=vmem_limit),
    )(patches_p, w_p)


def _call_stats(patches_p, w_p, tm, vmem_limit):
    m_pad, k_pad = patches_p.shape
    c_pad = w_p.shape[1]
    grid_m = m_pad // tm
    return pl.pallas_call(
        _stats_kernel,
        out_shape=(jax.ShapeDtypeStruct((8, c_pad), jnp.float32),
                   jax.ShapeDtypeStruct((8, c_pad), jnp.float32)),
        grid_spec=pltpu.PrefetchScalarGridSpec(
            num_scalar_prefetch=0,
            grid=(grid_m,),
            in_specs=[pl.BlockSpec((tm, k_pad), lambda i: (i, 0)),
                      pl.BlockSpec((k_pad, c_pad), lambda i: (0, 0))],
            out_specs=[pl.BlockSpec((8, c_pad), lambda i: (0, 0)),
                       pl.BlockSpec((8, c_pad), lambda i: (0, 0))]),
        compiler_params=pltpu.CompilerParams(
            dimension_semantics=("arbitrary",),
            vmem_limit_bytes=vmem_limit),
    )(patches_p, w_p)


def _call_bn_relu(y_p, scale_row, shift_row, tm, vmem_limit):
    m_pad, c_pad = y_p.shape
    grid_m = m_pad // tm
    return pl.pallas_call(
        _bn_relu_kernel,
        out_shape=jax.ShapeDtypeStruct((m_pad, c_pad), jnp.bfloat16),
        grid_spec=pltpu.PrefetchScalarGridSpec(
            num_scalar_prefetch=0,
            grid=(grid_m,),
            in_specs=[pl.BlockSpec((tm, c_pad), lambda i: (i, 0)),
                      pl.BlockSpec((1, c_pad), lambda i: (0, 0)),
                      pl.BlockSpec((1, c_pad), lambda i: (0, 0))],
            out_specs=pl.BlockSpec((tm, c_pad), lambda i: (i, 0))),
        compiler_params=pltpu.CompilerParams(
            dimension_semantics=("parallel",),
            vmem_limit_bytes=vmem_limit),
    )(y_p, scale_row, shift_row)


def _call_apply_recompute(patches_p, w_p, scale_row, shift_row, tm, vmem_limit):
    m_pad, k_pad = patches_p.shape
    c_pad = w_p.shape[1]
    grid_m = m_pad // tm
    return pl.pallas_call(
        _apply_recompute_kernel,
        out_shape=jax.ShapeDtypeStruct((m_pad, c_pad), jnp.bfloat16),
        grid_spec=pltpu.PrefetchScalarGridSpec(
            num_scalar_prefetch=0,
            grid=(grid_m,),
            in_specs=[pl.BlockSpec((tm, k_pad), lambda i: (i, 0)),
                      pl.BlockSpec((k_pad, c_pad), lambda i: (0, 0)),
                      pl.BlockSpec((1, c_pad), lambda i: (0, 0)),
                      pl.BlockSpec((1, c_pad), lambda i: (0, 0))],
            out_specs=pl.BlockSpec((tm, c_pad), lambda i: (i, 0))),
        compiler_params=pltpu.CompilerParams(
            dimension_semantics=("parallel",),
            vmem_limit_bytes=vmem_limit),
    )(patches_p, w_p, scale_row, shift_row)


# -----------------------------------------------------------------------------
# matmul + training-mode BN + ReLU for one stage
# -----------------------------------------------------------------------------
def _matmul_bn_relu(patches, w_mat, gamma, beta, groups, recompute):
    """ReLU(BN_train(patches @ w_mat)) where matmul columns are laid out as
    (groups, channels) and BN statistics reduce over rows AND groups.
    Returns bf16 of shape (m, groups*channels)."""
    m, k = patches.shape
    c_cols = w_mat.shape[1]
    nch = gamma.shape[0]
    assert c_cols == groups * nch

    k_pad = _round_up(k, 128)
    c_pad = _round_up(c_cols, 128)
    tm, m_pad = _pick_tile(m, k_pad, c_pad)
    vmem_limit = _vmem_limit(tm, k_pad, c_pad)

    patches_p = _pad2d(patches.astype(jnp.bfloat16), m_pad, k_pad)
    w_p = _pad2d(w_mat.astype(jnp.bfloat16), k_pad, c_pad)

    # ---- Phase 1: column moments (zero-padded rows/cols contribute exactly 0).
    if recompute:
        sums, sqs = _call_stats(patches_p, w_p, tm, vmem_limit)
        y_p = None
    else:
        y_p, sums, sqs = _call_stats_y(patches_p, w_p, tm, vmem_limit)

    col_sum = jnp.sum(sums, axis=0)[:c_cols]
    col_sq = jnp.sum(sqs, axis=0)[:c_cols]

    # ---- Fold BN into one per-channel scale/shift (biased variance, training).
    count = m * groups
    ch_sum = col_sum.reshape(groups, nch).sum(axis=0)
    ch_sq = col_sq.reshape(groups, nch).sum(axis=0)
    mean = ch_sum / count
    var = jnp.maximum(ch_sq / count - mean * mean, 0.0)
    inv_std = jax.lax.rsqrt(var + BN_EPS)
    scale_ch = gamma * inv_std
    shift_ch = beta - mean * scale_ch
    scale_row = _pad2d(jnp.tile(scale_ch, groups).reshape(1, c_cols), 1, c_pad)
    shift_row = _pad2d(jnp.tile(shift_ch, groups).reshape(1, c_cols), 1, c_pad)

    # ---- Phase 2: normalize + ReLU.
    if recompute:
        out_p = _call_apply_recompute(patches_p, w_p, scale_row, shift_row, tm, vmem_limit)
    else:
        out_p = _call_bn_relu(y_p, scale_row, shift_row, tm, vmem_limit)
    return out_p[:m, :c_cols]


# -----------------------------------------------------------------------------
# JAX glue: im2col, layout plumbing, full `up` forward
# -----------------------------------------------------------------------------
def _im2col_nhwc(x_nhwc, kh, kw, pad):
    """Extract conv patches. Returns (N*Ho*Wo, kh*kw*C), Ho, Wo."""
    n, h, w, c = x_nhwc.shape
    ho = h + 2 * pad - kh + 1
    wo = w + 2 * pad - kw + 1
    xp = jnp.pad(x_nhwc, ((0, 0), (pad, pad), (pad, pad), (0, 0)))
    cols = []
    for i in range(kh):
        for j in range(kw):
            cols.append(xp[:, i:i + ho, j:j + wo, :])
    patches = jnp.concatenate(cols, axis=-1)      # (N, Ho, Wo, kh*kw*C)
    return patches.reshape(n * ho * wo, kh * kw * c), ho, wo


@jax.jit
def up_forward(x1_nchw, x2_nchw,
               wT, gammaT, betaT,
               w1, gamma1, beta1,
               w2, gamma2, beta2):
    """Forward of up(inC, outC, momentum) in PyTorch training-mode semantics.

    x1_nchw: (N, inC-outC, 2H, 2W)   x2_nchw: (N, inC, H, W)
    wT: (inC, outC, 2, 2)  (ConvTranspose2d layout)
    w1: (outC, inC, 3, 3)  w2: (outC, outC, 3, 3)  (Conv2d layout)
    gamma*/beta*: (outC,)  BatchNorm affine parameters.
    Conv/ConvT biases are omitted: they cancel exactly under training-mode BN.
    Returns: (N, outC, 2H, 2W) float32
    """
    n, in_c, h2, w2_sp = x2_nchw.shape
    _, out_c, kt, _ = wT.shape

    # ---- Stage 1: ConvTranspose2d(k=2, s=2, p=0) + BN + ReLU (recompute path)
    x2_nhwc = jnp.transpose(x2_nchw, (0, 2, 3, 1))
    flat2 = x2_nhwc.reshape(n * h2 * w2_sp, in_c)
    # columns laid out as (kh, kw, outC)
    wT_mat = jnp.transpose(wT, (0, 2, 3, 1)).reshape(in_c, kt * kt * out_c)
    y_up = _matmul_bn_relu(flat2, wT_mat, gammaT, betaT, groups=kt * kt, recompute=True)
    # depth-to-space: (N,H,W,kh,kw,C) -> (N, 2H, 2W, C)
    # TODO(synk): write depth-to-space order directly from the apply out_spec.
    y_up = y_up.reshape(n, h2, w2_sp, kt, kt, out_c)
    y_up = jnp.transpose(y_up, (0, 1, 3, 2, 4, 5)).reshape(n, kt * h2, kt * w2_sp, out_c)

    # ---- Stage 2: channel concat (x1 first, matching torch.cat([x1,x2],1)) --
    x1_nhwc = jnp.transpose(x1_nchw, (0, 2, 3, 1)).astype(jnp.bfloat16)
    cat = jnp.concatenate([x1_nhwc, y_up], axis=-1)

    # ---- Stages 3/4: double_conv = 2 x (3x3 conv p=1 -> BN -> ReLU) ---------
    def conv3_bn_relu(x_nhwc, w, gamma, beta):
        nn_, hh, ww, cc = x_nhwc.shape
        oc = w.shape[0]
        patches, ho, wo = _im2col_nhwc(x_nhwc, 3, 3, 1)
        w_mat = jnp.transpose(w, (2, 3, 1, 0)).reshape(9 * cc, oc)
        y = _matmul_bn_relu(patches, w_mat, gamma, beta, groups=1, recompute=False)
        return y.reshape(nn_, ho, wo, oc)

    y = conv3_bn_relu(cat, w1, gamma1, beta1)
    y = conv3_bn_relu(y, w2, gamma2, beta2)
    return jnp.transpose(y, (0, 3, 1, 2)).astype(jnp.float32)   # NHWC -> NCHW


# -----------------------------------------------------------------------------
# Pure-JAX/XLA f32 reference (independent path, conv biases included)
# -----------------------------------------------------------------------------
def _ref_bn_relu_nchw(y, gamma, beta):
    mean = jnp.mean(y, axis=(0, 2, 3), keepdims=True)
    var = jnp.mean((y - mean) ** 2, axis=(0, 2, 3), keepdims=True)
    yn = gamma.reshape(1, -1, 1, 1) * (y - mean) * jax.lax.rsqrt(var + BN_EPS)
    return jnp.maximum(yn + beta.reshape(1, -1, 1, 1), 0.0)


def up_reference(x1, x2, wT, bT, gammaT, betaT,
                 w1, b1, gamma1, beta1, w2, b2, gamma2, beta2):
    dn = ("NCHW", "OIHW", "NCHW")
    # ConvTranspose2d(k=2,s=2,p=0) == lhs-dilated conv with flipped, io-swapped kernel.
    kT = jnp.transpose(wT, (1, 0, 2, 3))[:, :, ::-1, ::-1]
    y = jax.lax.conv_general_dilated(x2, kT, window_strides=(1, 1),
                                     padding=((1, 1), (1, 1)), lhs_dilation=(2, 2),
                                     dimension_numbers=dn)
    y = _ref_bn_relu_nchw(y + bT.reshape(1, -1, 1, 1), gammaT, betaT)
    x = jnp.concatenate([x1, y], axis=1)
    y = jax.lax.conv_general_dilated(x, w1, (1, 1), ((1, 1), (1, 1)), dimension_numbers=dn)
    y = _ref_bn_relu_nchw(y + b1.reshape(1, -1, 1, 1), gamma1, beta1)
    y = jax.lax.conv_general_dilated(y, w2, (1, 1), ((1, 1), (1, 1)), dimension_numbers=dn)
    y = _ref_bn_relu_nchw(y + b2.reshape(1, -1, 1, 1), gamma2, beta2)
    return y


if __name__ == "__main__":
    # Module config: up(inC, outC, momentum). cat channels must equal inC, so
    # x1 carries (inC - outC) channels at the upsampled resolution.
    inC, outC = 4, 2
    momentum = 0.1        # only affects (untracked) running stats; no forward effect
    N, H2, W2 = 2, 8, 8   # x2 (low-res) spatial
    H1, W1 = 2 * H2, 2 * W2
    c1 = inC - outC

    key = jax.random.PRNGKey(0)
    keys = jax.random.split(key, 16)

    x1 = jax.random.normal(keys[0], (N, c1, H1, W1), dtype=jnp.float32)
    x2 = jax.random.normal(keys[1], (N, inC, H2, W2), dtype=jnp.float32)

    def uinit(k, shape, fan_in):
        bound = 1.0 / (fan_in ** 0.5)
        return jax.random.uniform(k, shape, minval=-bound, maxval=bound, dtype=jnp.float32)

    wT = uinit(keys[2], (inC, outC, 2, 2), inC * 4)       # ConvTranspose2d weight
    bT = uinit(keys[3], (outC,), inC * 4)
    w1 = uinit(keys[4], (outC, inC, 3, 3), inC * 9)       # Conv2d #1 weight
    b1 = uinit(keys[5], (outC,), inC * 9)
    w2 = uinit(keys[6], (outC, outC, 3, 3), outC * 9)     # Conv2d #2 weight
    b2 = uinit(keys[7], (outC,), outC * 9)

    gT = 1.0 + 0.1 * jax.random.normal(keys[8], (outC,), dtype=jnp.float32)
    beT = 0.1 * jax.random.normal(keys[9], (outC,), dtype=jnp.float32)
    g1 = 1.0 + 0.1 * jax.random.normal(keys[10], (outC,), dtype=jnp.float32)
    be1 = 0.1 * jax.random.normal(keys[11], (outC,), dtype=jnp.float32)
    g2 = 1.0 + 0.1 * jax.random.normal(keys[12], (outC,), dtype=jnp.float32)
    be2 = 0.1 * jax.random.normal(keys[13], (outC,), dtype=jnp.float32)

    out = up_forward(x1, x2, wT, gT, beT, w1, g1, be1, w2, g2, be2)
    out = jax.block_until_ready(out)
    assert out.shape == (N, outC, H1, W1), out.shape

    # Check against an independent f32 XLA reference. The kernel path uses bf16
    # matmul inputs and bf16 inter-stage activations (per the perf review), so the
    # tolerance is loosened; real layout/BN-folding bugs would be O(1) errors.
    ref = up_reference(x1, x2, wT, bT, gT, beT, w1, b1, g1, be1, w2, b2, g2, be2)
    np.testing.assert_allclose(np.asarray(out), np.asarray(ref), rtol=5e-2, atol=5e-2)

    print("KERNEL_OK")
</pallas_src>

<mosaic_0001>
module attributes {stable_mosaic.version = 11 : i64} {
  func.func @_stats_kernel(%arg0: i32, %arg1: memref<128x128xbf16, #tpu.memory_space<vmem>>, %arg2: memref<128x128xbf16, #tpu.memory_space<vmem>>, %arg3: memref<8x128xf32, #tpu.memory_space<vmem>>, %arg4: memref<8x128xf32, #tpu.memory_space<vmem>>) attributes {dimension_semantics = [#tpu.dimension_semantics<arbitrary>], iteration_bounds = array<i64: 1>, scalar_prefetch = 0 : i64, scratch_operands = 0 : i64, tpu.core_type = #tpu.core_type<tc>, window_params = [{transform_indices = @transform_0, window_bounds = array<i64: 128, 128>}, {pipeline_mode = #tpu.pipeline_mode<synchronous>, transform_indices = @transform_1, window_bounds = array<i64: 128, 128>}, {pipeline_mode = #tpu.pipeline_mode<synchronous>, transform_indices = @transform_2, window_bounds = array<i64: 8, 128>}, {pipeline_mode = #tpu.pipeline_mode<synchronous>, transform_indices = @transform_3, window_bounds = array<i64: 8, 128>}]} {
    %c0_i32 = arith.constant 0 : i32
    %0 = arith.cmpi eq, %arg0, %c0_i32 : i32
    %1 = arith.extui %0 : i1 to i32
    %c0_i32_0 = arith.constant 0 : i32
    %2 = arith.cmpi ne, %1, %c0_i32_0 : i32
    scf.if %2 {
      %cst_14 = arith.constant 0.000000e+00 : f32
      %16 = vector.broadcast %cst_14 : f32 to vector<8x128xf32>
      %c0_15 = arith.constant 0 : index
      %c0_16 = arith.constant 0 : index
      %17 = vector.load %arg3[%c0_15, %c0_16] : memref<8x128xf32, #tpu.memory_space<vmem>>, vector<8x128xf32>
      tpu.vector_store %arg3[%c0_15, %c0_16], %16 {strides = array<i32>} : memref<8x128xf32, #tpu.memory_space<vmem>>, vector<8x128xf32>,
      %cst_17 = arith.constant 0.000000e+00 : f32
      %18 = vector.broadcast %cst_17 : f32 to vector<8x128xf32>
      %c0_18 = arith.constant 0 : index
      %c0_19 = arith.constant 0 : index
      %19 = vector.load %arg4[%c0_18, %c0_19] : memref<8x128xf32, #tpu.memory_space<vmem>>, vector<8x128xf32>
      tpu.vector_store %arg4[%c0_18, %c0_19], %18 {strides = array<i32>} : memref<8x128xf32, #tpu.memory_space<vmem>>, vector<8x128xf32>,
    } else {
    }
    %c0 = arith.constant 0 : index
    %c0_1 = arith.constant 0 : index
    %3 = vector.load %arg1[%c0, %c0_1] : memref<128x128xbf16, #tpu.memory_space<vmem>>, vector<128x128xbf16>
    %c0_2 = arith.constant 0 : index
    %c0_3 = arith.constant 0 : index
    %4 = vector.load %arg2[%c0_2, %c0_3] : memref<128x128xbf16, #tpu.memory_space<vmem>>, vector<128x128xbf16>
    %cst = arith.constant dense<0.000000e+00> : vector<128x128xf32>
    %5 = tpu.matmul %3, %4, %cst {dimension_numbers = #tpu.dot_dimension_numbers<[1], [0], [0], [1], [0, 0, 1, 1], [], []>} : vector<128x128xbf16>, vector<128x128xbf16>, vector<128x128xf32> -> vector<128x128xf32>
    %6 = vector.shape_cast %5 : vector<128x128xf32> to vector<16x8x128xf32>
    %c0_4 = arith.constant 0 : index
    %c0_5 = arith.constant 0 : index
    %7 = vector.load %arg3[%c0_4, %c0_5] : memref<8x128xf32, #tpu.memory_space<vmem>>, vector<8x128xf32>
    %cst_6 = arith.constant dense<0.000000e+00> : vector<8x128xf32>
    %8 = vector.multi_reduction <add>, %6, %cst_6 [0] : vector<16x8x128xf32> to vector<8x128xf32>
    %9 = arith.addf %7, %8 : vector<8x128xf32>
    %c0_7 = arith.constant 0 : index
    %c0_8 = arith.constant 0 : index
    %10 = vector.load %arg3[%c0_7, %c0_8] : memref<8x128xf32, #tpu.memory_space<vmem>>, vector<8x128xf32>
    tpu.vector_store %arg3[%c0_7, %c0_8], %9 {strides = array<i32>} : memref<8x128xf32, #tpu.memory_space<vmem>>, vector<8x128xf32>,
    %c0_9 = arith.constant 0 : index
    %c0_10 = arith.constant 0 : index
    %11 = vector.load %arg4[%c0_9, %c0_10] : memref<8x128xf32, #tpu.memory_space<vmem>>, vector<8x128xf32>
    %12 = arith.mulf %6, %6 : vector<16x8x128xf32>
    %cst_11 = arith.constant dense<0.000000e+00> : vector<8x128xf32>
    %13 = vector.multi_reduction <add>, %12, %cst_11 [0] : vector<16x8x128xf32> to vector<8x128xf32>
    %14 = arith.addf %11, %13 : vector<8x128xf32>
    %c0_12 = arith.constant 0 : index
    %c0_13 = arith.constant 0 : index
    %15 = vector.load %arg4[%c0_12, %c0_13] : memref<8x128xf32, #tpu.memory_space<vmem>>, vector<8x128xf32>
    tpu.vector_store %arg4[%c0_12, %c0_13], %14 {strides = array<i32>} : memref<8x128xf32, #tpu.memory_space<vmem>>, vector<8x128xf32>,
    return
  }
  func.func @transform_0(%arg0: i32) -> (i32, i32) {
    %c0_i32 = arith.constant 0 : i32
    %c0_i32_0 = arith.constant 0 : i32
    return %arg0, %c0_i32 : i32, i32
  }
  func.func @transform_1(%arg0: i32) -> (i32, i32) {
    %c0_i32 = arith.constant 0 : i32
    %c0_i32_0 = arith.constant 0 : i32
    %c0_i32_1 = arith.constant 0 : i32
    return %c0_i32, %c0_i32_0 : i32, i32
  }
  func.func @transform_2(%arg0: i32) -> (i32, i32) {
    %c0_i32 = arith.constant 0 : i32
    %c0_i32_0 = arith.constant 0 : i32
    %c0_i32_1 = arith.constant 0 : i32
    return %c0_i32, %c0_i32_0 : i32, i32
  }
  func.func @transform_3(%arg0: i32) -> (i32, i32) {
    %c0_i32 = arith.constant 0 : i32
    %c0_i32_0 = arith.constant 0 : i32
    %c0_i32_1 = arith.constant 0 : i32
    return %c0_i32, %c0_i32_0 : i32, i32
  }
}

module attributes {stable_mosaic.version = 11 : i64} {
  func.func @_apply_recompute_kernel(%arg0: i32, %arg1: memref<128x128xbf16, #tpu.memory_space<vmem>>, %arg2: memref<128x128xbf16, #tpu.memory_space<vmem>>, %arg3: memref<1x128xf32, #tpu.memory_space<vmem>>, %arg4: memref<1x128xf32, #tpu.memory_space<vmem>>, %arg5: memref<128x128xbf16, #tpu.memory_space<vmem>>) attributes {dimension_semantics = [#tpu.dimension_semantics<parallel>], iteration_bounds = array<i64: 1>, scalar_prefetch = 0 : i64, scratch_operands = 0 : i64, tpu.core_type = #tpu.core_type<tc>, window_params = [{transform_indices = @transform_0, window_bounds = array<i64: 128, 128>}, {pipeline_mode = #tpu.pipeline_mode<synchronous>, transform_indices = @transform_1, window_bounds = array<i64: 128, 128>}, {pipeline_mode = #tpu.pipeline_mode<synchronous>, transform_indices = @transform_2, window_bounds = array<i64: 1, 128>}, {pipeline_mode = #tpu.pipeline_mode<synchronous>, transform_indices = @transform_3, window_bounds = array<i64: 1, 128>}, {transform_indices = @transform_4, window_bounds = array<i64: 128, 128>}]} {
    %c0 = arith.constant 0 : index
    %c0_0 = arith.constant 0 : index
    %0 = vector.load %arg1[%c0, %c0_0] : memref<128x128xbf16, #tpu.memory_space<vmem>>, vector<128x128xbf16>
    %c0_1 = arith.constant 0 : index
    %c0_2 = arith.constant 0 : index
    %1 = vector.load %arg2[%c0_1, %c0_2] : memref<128x128xbf16, #tpu.memory_space<vmem>>, vector<128x128xbf16>
    %cst = arith.constant dense<0.000000e+00> : vector<128x128xf32>
    %2 = tpu.matmul %0, %1, %cst {dimension_numbers = #tpu.dot_dimension_numbers<[1], [0], [0], [1], [0, 0, 1, 1], [], []>} : vector<128x128xbf16>, vector<128x128xbf16>, vector<128x128xf32> -> vector<128x128xf32>
    %c0_3 = arith.constant 0 : index
    %c0_4 = arith.constant 0 : index
    %3 = vector.load %arg3[%c0_3, %c0_4] : memref<1x128xf32, #tpu.memory_space<vmem>>, vector<1x128xf32>
    %4 = vector.broadcast %3 : vector<1x128xf32> to vector<128x128xf32>
    %5 = arith.mulf %2, %4 : vector<128x128xf32>
    %c0_5 = arith.constant 0 : index
    %c0_6 = arith.constant 0 : index
    %6 = vector.load %arg4[%c0_5, %c0_6] : memref<1x128xf32, #tpu.memory_space<vmem>>, vector<1x128xf32>
    %7 = vector.broadcast %6 : vector<1x128xf32> to vector<128x128xf32>
    %8 = arith.addf %5, %7 : vector<128x128xf32>
    %cst_7 = arith.constant 0.000000e+00 : f32
    %9 = vector.broadcast %cst_7 : f32 to vector<128x128xf32>
    %10 = arith.maximumf %8, %9 : vector<128x128xf32>
    %11 = arith.truncf %10 : vector<128x128xf32> to vector<128x128xbf16>
    %c0_8 = arith.constant 0 : index
    %c0_9 = arith.constant 0 : index
    %12 = vector.load %arg5[%c0_8, %c0_9] : memref<128x128xbf16, #tpu.memory_space<vmem>>, vector<128x128xbf16>
    tpu.vector_store %arg5[%c0_8, %c0_9], %11 {strides = array<i32>} : memref<128x128xbf16, #tpu.memory_space<vmem>>, vector<128x128xbf16>,
    return
  }
  func.func @transform_0(%arg0: i32) -> (i32, i32) {
    %c0_i32 = arith.constant 0 : i32
    %c0_i32_0 = arith.constant 0 : i32
    return %arg0, %c0_i32 : i32, i32
  }
  func.func @transform_1(%arg0: i32) -> (i32, i32) {
    %c0_i32 = arith.constant 0 : i32
    %c0_i32_0 = arith.constant 0 : i32
    %c0_i32_1 = arith.constant 0 : i32
    return %c0_i32, %c0_i32_0 : i32, i32
  }
  func.func @transform_2(%arg0: i32) -> (i32, i32) {
    %c0_i32 = arith.constant 0 : i32
    %c0_i32_0 = arith.constant 0 : i32
    %c0_i32_1 = arith.constant 0 : i32
    return %c0_i32, %c0_i32_0 : i32, i32
  }
  func.func @transform_3(%arg0: i32) -> (i32, i32) {
    %c0_i32 = arith.constant 0 : i32
    %c0_i32_0 = arith.constant 0 : i32
    %c0_i32_1 = arith.constant 0 : i32
    return %c0_i32, %c0_i32_0 : i32, i32
  }
  func.func @transform_4(%arg0: i32) -> (i32, i32) {
    %c0_i32 = arith.constant 0 : i32
    %c0_i32_0 = arith.constant 0 : i32
    return %arg0, %c0_i32 : i32, i32
  }
}

module attributes {stable_mosaic.version = 11 : i64} {
  func.func @_stats_y_kernel(%arg0: i32, %arg1: memref<512x128xbf16, #tpu.memory_space<vmem>>, %arg2: memref<128x128xbf16, #tpu.memory_space<vmem>>, %arg3: memref<512x128xbf16, #tpu.memory_space<vmem>>, %arg4: memref<8x128xf32, #tpu.memory_space<vmem>>, %arg5: memref<8x128xf32, #tpu.memory_space<vmem>>) attributes {dimension_semantics = [#tpu.dimension_semantics<arbitrary>], iteration_bounds = array<i64: 1>, scalar_prefetch = 0 : i64, scratch_operands = 0 : i64, tpu.core_type = #tpu.core_type<tc>, window_params = [{transform_indices = @transform_0, window_bounds = array<i64: 512, 128>}, {pipeline_mode = #tpu.pipeline_mode<synchronous>, transform_indices = @transform_1, window_bounds = array<i64: 128, 128>}, {transform_indices = @transform_2, window_bounds = array<i64: 512, 128>}, {pipeline_mode = #tpu.pipeline_mode<synchronous>, transform_indices = @transform_3, window_bounds = array<i64: 8, 128>}, {pipeline_mode = #tpu.pipeline_mode<synchronous>, transform_indices = @transform_4, window_bounds = array<i64: 8, 128>}]} {
    %c0_i32 = arith.constant 0 : i32
    %0 = arith.cmpi eq, %arg0, %c0_i32 : i32
    %1 = arith.extui %0 : i1 to i32
    %c0_i32_0 = arith.constant 0 : i32
    %2 = arith.cmpi ne, %1, %c0_i32_0 : i32
    scf.if %2 {
      %cst_16 = arith.constant 0.000000e+00 : f32
      %18 = vector.broadcast %cst_16 : f32 to vector<8x128xf32>
      %c0_17 = arith.constant 0 : index
      %c0_18 = arith.constant 0 : index
      %19 = vector.load %arg4[%c0_17, %c0_18] : memref<8x128xf32, #tpu.memory_space<vmem>>, vector<8x128xf32>
      tpu.vector_store %arg4[%c0_17, %c0_18], %18 {strides = array<i32>} : memref<8x128xf32, #tpu.memory_space<vmem>>, vector<8x128xf32>,
      %cst_19 = arith.constant 0.000000e+00 : f32
      %20 = vector.broadcast %cst_19 : f32 to vector<8x128xf32>
      %c0_20 = arith.constant 0 : index
      %c0_21 = arith.constant 0 : index
      %21 = vector.load %arg5[%c0_20, %c0_21] : memref<8x128xf32, #tpu.memory_space<vmem>>, vector<8x128xf32>
      tpu.vector_store %arg5[%c0_20, %c0_21], %20 {strides = array<i32>} : memref<8x128xf32, #tpu.memory_space<vmem>>, vector<8x128xf32>,
    } else {
    }
    %c0 = arith.constant 0 : index
    %c0_1 = arith.constant 0 : index
    %3 = vector.load %arg1[%c0, %c0_1] : memref<512x128xbf16, #tpu.memory_space<vmem>>, vector<512x128xbf16>
    %c0_2 = arith.constant 0 : index
    %c0_3 = arith.constant 0 : index
    %4 = vector.load %arg2[%c0_2, %c0_3] : memref<128x128xbf16, #tpu.memory_space<vmem>>, vector<128x128xbf16>
    %cst = arith.constant dense<0.000000e+00> : vector<512x128xf32>
    %5 = tpu.matmul %3, %4, %cst {dimension_numbers = #tpu.dot_dimension_numbers<[1], [0], [0], [1], [0, 0, 1, 1], [], []>} : vector<512x128xbf16>, vector<128x128xbf16>, vector<512x128xf32> -> vector<512x128xf32>
    %6 = arith.truncf %5 : vector<512x128xf32> to vector<512x128xbf16>
    %c0_4 = arith.constant 0 : index
    %c0_5 = arith.constant 0 : index
    %7 = vector.load %arg3[%c0_4, %c0_5] : memref<512x128xbf16, #tpu.memory_space<vmem>>, vector<512x128xbf16>
    tpu.vector_store %arg3[%c0_4, %c0_5], %6 {strides = array<i32>} : memref<512x128xbf16, #tpu.memory_space<vmem>>, vector<512x128xbf16>,
    %8 = vector.shape_cast %5 : vector<512x128xf32> to vector<64x8x128xf32>
    %c0_6 = arith.constant 0 : index
    %c0_7 = arith.constant 0 : index
    %9 = vector.load %arg4[%c0_6, %c0_7] : memref<8x128xf32, #tpu.memory_space<vmem>>, vector<8x128xf32>
    %cst_8 = arith.constant dense<0.000000e+00> : vector<8x128xf32>
    %10 = vector.multi_reduction <add>, %8, %cst_8 [0] : vector<64x8x128xf32> to vector<8x128xf32>
    %11 = arith.addf %9, %10 : vector<8x128xf32>
    %c0_9 = arith.constant 0 : index
    %c0_10 = arith.constant 0 : index
    %12 = vector.load %arg4[%c0_9, %c0_10] : memref<8x128xf32, #tpu.memory_space<vmem>>, vector<8x128xf32>
    tpu.vector_store %arg4[%c0_9, %c0_10], %11 {strides = array<i32>} : memref<8x128xf32, #tpu.memory_space<vmem>>, vector<8x128xf32>,
    %c0_11 = arith.constant 0 : index
    %c0_12 = arith.constant 0 : index
    %13 = vector.load %arg5[%c0_11, %c0_12] : memref<8x128xf32, #tpu.memory_space<vmem>>, vector<8x128xf32>
    %14 = arith.mulf %8, %8 : vector<64x8x128xf32>
    %cst_13 = arith.constant dense<0.000000e+00> : vector<8x128xf32>
    %15 = vector.multi_reduction <add>, %14, %cst_13 [0] : vector<64x8x128xf32> to vector<8x128xf32>
    %16 = arith.addf %13, %15 : vector<8x128xf32>
    %c0_14 = arith.constant 0 : index
    %c0_15 = arith.constant 0 : index
    %17 = vector.load %arg5[%c0_14, %c0_15] : memref<8x128xf32, #tpu.memory_space<vmem>>, vector<8x128xf32>
    tpu.vector_store %arg5[%c0_14, %c0_15], %16 {strides = array<i32>} : memref<8x128xf32, #tpu.memory_space<vmem>>, vector<8x128xf32>,
    return
  }
  func.func @transform_0(%arg0: i32) -> (i32, i32) {
    %c0_i32 = arith.constant 0 : i32
    %c0_i32_0 = arith.constant 0 : i32
    return %arg0, %c0_i32 : i32, i32
  }
  func.func @transform_1(%arg0: i32) -> (i32, i32) {
    %c0_i32 = arith.constant 0 : i32
    %c0_i32_0 = arith.constant 0 : i32
    %c0_i32_1 = arith.constant 0 : i32
    return %c0_i32, %c0_i32_0 : i32, i32
  }
  func.func @transform_2(%arg0: i32) -> (i32, i32) {
    %c0_i32 = arith.constant 0 : i32
    %c0_i32_0 = arith.constant 0 : i32
    return %arg0, %c0_i32 : i32, i32
  }
  func.func @transform_3(%arg0: i32) -> (i32, i32) {
    %c0_i32 = arith.constant 0 : i32
    %c0_i32_0 = arith.constant 0 : i32
    %c0_i32_1 = arith.constant 0 : i32
    return %c0_i32, %c0_i32_0 : i32, i32
  }
  func.func @transform_4(%arg0: i32) -> (i32, i32) {
    %c0_i32 = arith.constant 0 : i32
    %c0_i32_0 = arith.constant 0 : i32
    %c0_i32_1 = arith.constant 0 : i32
    return %c0_i32, %c0_i32_0 : i32, i32
  }
}

module attributes {stable_mosaic.version = 11 : i64} {
  func.func @_bn_relu_kernel(%arg0: i32, %arg1: memref<512x128xbf16, #tpu.memory_space<vmem>>, %arg2: memref<1x128xf32, #tpu.memory_space<vmem>>, %arg3: memref<1x128xf32, #tpu.memory_space<vmem>>, %arg4: memref<512x128xbf16, #tpu.memory_space<vmem>>) attributes {dimension_semantics = [#tpu.dimension_semantics<parallel>], iteration_bounds = array<i64: 1>, scalar_prefetch = 0 : i64, scratch_operands = 0 : i64, tpu.core_type = #tpu.core_type<tc>, window_params = [{transform_indices = @transform_0, window_bounds = array<i64: 512, 128>}, {pipeline_mode = #tpu.pipeline_mode<synchronous>, transform_indices = @transform_1, window_bounds = array<i64: 1, 128>}, {pipeline_mode = #tpu.pipeline_mode<synchronous>, transform_indices = @transform_2, window_bounds = array<i64: 1, 128>}, {transform_indices = @transform_3, window_bounds = array<i64: 512, 128>}]} {
    %c0 = arith.constant 0 : index
    %c0_0 = arith.constant 0 : index
    %0 = vector.load %arg1[%c0, %c0_0] : memref<512x128xbf16, #tpu.memory_space<vmem>>, vector<512x128xbf16>
    %1 = arith.extf %0 : vector<512x128xbf16> to vector<512x128xf32>
    %c0_1 = arith.constant 0 : index
    %c0_2 = arith.constant 0 : index
    %2 = vector.load %arg2[%c0_1, %c0_2] : memref<1x128xf32, #tpu.memory_space<vmem>>, vector<1x128xf32>
    %3 = vector.broadcast %2 : vector<1x128xf32> to vector<512x128xf32>
    %4 = arith.mulf %1, %3 : vector<512x128xf32>
    %c0_3 = arith.constant 0 : index
    %c0_4 = arith.constant 0 : index
    %5 = vector.load %arg3[%c0_3, %c0_4] : memref<1x128xf32, #tpu.memory_space<vmem>>, vector<1x128xf32>
    %6 = vector.broadcast %5 : vector<1x128xf32> to vector<512x128xf32>
    %7 = arith.addf %4, %6 : vector<512x128xf32>
    %cst = arith.constant 0.000000e+00 : f32
    %8 = vector.broadcast %cst : f32 to vector<512x128xf32>
    %9 = arith.maximumf %7, %8 : vector<512x128xf32>
    %10 = arith.truncf %9 : vector<512x128xf32> to vector<512x128xbf16>
    %c0_5 = arith.constant 0 : index
    %c0_6 = arith.constant 0 : index
    %11 = vector.load %arg4[%c0_5, %c0_6] : memref<512x128xbf16, #tpu.memory_space<vmem>>, vector<512x128xbf16>
    tpu.vector_store %arg4[%c0_5, %c0_6], %10 {strides = array<i32>} : memref<512x128xbf16, #tpu.memory_space<vmem>>, vector<512x128xbf16>,
    return
  }
  func.func @transform_0(%arg0: i32) -> (i32, i32) {
    %c0_i32 = arith.constant 0 : i32
    %c0_i32_0 = arith.constant 0 : i32
    return %arg0, %c0_i32 : i32, i32
  }
  func.func @transform_1(%arg0: i32) -> (i32, i32) {
    %c0_i32 = arith.constant 0 : i32
    %c0_i32_0 = arith.constant 0 : i32
    %c0_i32_1 = arith.constant 0 : i32
    return %c0_i32, %c0_i32_0 : i32, i32
  }
  func.func @transform_2(%arg0: i32) -> (i32, i32) {
    %c0_i32 = arith.constant 0 : i32
    %c0_i32_0 = arith.constant 0 : i32
    %c0_i32_1 = arith.constant 0 : i32
    return %c0_i32, %c0_i32_0 : i32, i32
  }
  func.func @transform_3(%arg0: i32) -> (i32, i32) {
    %c0_i32 = arith.constant 0 : i32
    %c0_i32_0 = arith.constant 0 : i32
    return %arg0, %c0_i32 : i32, i32
  }
}

</mosaic_0001>

<bundles_post_ra>
// kernel: tile.17
= control target key start
LH: loop header
LB: loop body
LE: loop exit
PB: predicated region body
PF: predicated region fallthrough
CT: control target
= control target key end

     0   :  { %s22_s0 = inlined_call_operand.vmem [shape: f32[2], index: 0, kind: input, shape index: {}]   ;;  %s23_s1 = inlined_call_operand.vmem [shape: f32[4,2], index: 1, kind: output, shape index: {}]  }
   0x1   :  { %v4_v0 = vld [vmem:[%s22_s0] ss:$0 sm:$0xff] }
   0x2   :  { %5 = vst [vmem:[%s23_s1] sm:$0xf] %v4_v0 }

// kernel: tile.18
= control target key start
LH: loop header
LB: loop body
LE: loop exit
PB: predicated region body
PF: predicated region fallthrough
CT: control target
= control target key end

     0   :  { %vm8_vm0 = vcmask 15360   ;;  %s40_s8 = smov 2   ;;  %s41_s9 = smov 4   ;;  %vm14_vm1 = vcmask 64560   ;;  %vm20_vm2 = vcmask 48160   ;;  %vm26_vm3 = vcmask 31760   ;;  %s58_s0 = inlined_call_operand.vmem [shape: f32[4,2], index: 0, kind: input, shape index: {}]   ;;  %s59_s1 = inlined_call_operand.vmem [shape: f32[1,8], index: 1, kind: output, shape index: {}]  }
   0x1   :  { %v5_v0 = vld [vmem:[%s58_s0] sm:$0xf]  ;;  %s39_s0 = smov 6  }
   0x2   :  { %6 = vst [vmem:[#allocation1] sm:$0xf] %v5_v0 }
   0x9   :  { %v11_v1 = vld [vmem:[#allocation1 + $0x3] sm:$0x1]   ;;  %v23_v2 = vld [vmem:[#allocation1 + $0x1] sm:$0x1]   ;;  %v7_v3 = vld [vmem:[#allocation1] sm:$0x1]  }
   0xa   :  { %12 = vrot.lane.b32.xlu0 %v11_v1, %s39_s0  ;;  %24 = vrot.lane.b32.xlu1 %v23_v2, %s40_s8  ;;  %v17_v4 = vld [vmem:[#allocation1 + $0x2] sm:$0x1]   ;;  %9 = vst.msk [vmem:[#allocation0] sm:$0x1] %vm8_vm0, %v7_v3  }
   0xe   :  { %18 = vrot.lane.b32.xlu0 %v17_v4, %s41_s9 }
  0x7c   :  { %v13_v5 = vpop.permute.xlu0 %12   ;;  %v25_v6 = vpop.permute.xlu1 %24  }
  0x7d   :  { %15 = vst.msk [vmem:[#allocation0] sm:$0x1] %vm14_vm1, %v13_v5  }
  0x80   :  { %v19_v7 = vpop.permute.xlu0 %18  }
  0x81   :  { %21 = vst.msk [vmem:[#allocation0] sm:$0x1] %vm20_vm2, %v19_v7  }
  0x82   :  { %27 = vst.msk [vmem:[#allocation0] sm:$0x1] %vm26_vm3, %v25_v6  }
  0x89   :  { %v32_v8 = vld [vmem:[#allocation0] sm:$0x1] }
  0x8a   :  { %35 = vst [vmem:[%s59_s1] sm:$0x1] %v32_v8 }

// kernel: up_forward.6
= control target key start
LH: loop header
LB: loop body
LE: loop exit
PB: predicated region body
PF: predicated region fallthrough
CT: control target
= control target key end

     0   :  { %s476_s1 = inlined_call_operand.vmem [shape: bf16[128,128], index: 1, kind: input, shape index: {}]   ;;  %s477_s0 = inlined_call_operand.vmem [shape: bf16[128,128], index: 0, kind: input, shape index: {}]   ;;  %s478_s2 = inlined_call_operand.vmem [shape: f32[8,128], index: 2, kind: output, shape index: {0}]   ;;  %s479_s3 = inlined_call_operand.vmem [shape: f32[8,128], index: 3, kind: output, shape index: {1}]  }
   0x1   :  { %v386_v0 = vld [vmem:[%s476_s1 + $0x38] sm:$0xff]   ;;  %v387_v1 = vld [vmem:[%s476_s1 + $0x30] sm:$0xff]   ;;  %v388_v2 = vld [vmem:[%s476_s1 + $0x28] sm:$0xff]  }
   0x2   :  { %337 = vmatprep.subr.bf16.mxu0 %v386_v0  ;;  %369 = vmatprep.subr.bf16.mxu1 %v386_v0  ;;  %v389_v3 = vld [vmem:[%s476_s1 + $0x20] sm:$0xff]   ;;  %v390_v5 = vld [vmem:[%s476_s1 + $0x18] sm:$0xff]   ;;  %v391_v7 = vld [vmem:[%s476_s1 + $0x10] sm:$0xff]  }
   0x3   :  { %338 = vmatpush3.bf16.msra.mxu0 %v386_v0  ;;  %377 = vmatpush3.bf16.msra.mxu1 %v386_v0  ;;  %v394_v4 = vld [vmem:[%s477_s0] sm:$0xff]   ;;  %v392_v8 = vld [vmem:[%s476_s1 + $0x8] sm:$0xff]   ;;  %v396_v12 = vld [vmem:[%s477_s0 + $0x10] sm:$0xff]  }
   0x4   :  { %339 = vmatprep.subr.bf16.mxu0 %v387_v1  ;;  %370 = vmatprep.subr.bf16.mxu1 %v387_v1  ;;  %v398_v6 = vld [vmem:[%s477_s0 + $0x20] sm:$0xff]   ;;  %v395_v10 = vld [vmem:[%s477_s0 + $0x8] sm:$0xff]   ;;  %v400_v13 = vld [vmem:[%s477_s0 + $0x30] sm:$0xff]  }
   0x5   :  { %353 = vmatprep.mubr.bf16.mxu0 %v394_v4  ;;  %361 = vmatprep.mubr.bf16.mxu1 %v398_v6  ;;  %v393_v9 = vld [vmem:[%s476_s1] sm:$0xff]   ;;  %v399_v11 = vld [vmem:[%s477_s0 + $0x28] sm:$0xff]   ;;  %v397_v14 = vld [vmem:[%s477_s0 + $0x18] sm:$0xff]  }
   0x6   :  { %v401_v15 = vld [vmem:[%s477_s0 + $0x38] sm:$0xff]  }
   0x7   :  { %340 = vmatpush3.bf16.msra.mxu0 %v387_v1  ;;  %378 = vmatpush3.bf16.msra.mxu1 %v387_v1 }
   0x8   :  { %341 = vmatprep.subr.bf16.mxu0 %v388_v2  ;;  %371 = vmatprep.subr.bf16.mxu1 %v388_v2 }
   0xb   :  { %342 = vmatpush3.bf16.msra.mxu0 %v388_v2  ;;  %379 = vmatpush3.bf16.msra.mxu1 %v388_v2 }
   0xc   :  { %343 = vmatprep.subr.bf16.mxu0 %v389_v3  ;;  %372 = vmatprep.subr.bf16.mxu1 %v389_v3 }
   0xf   :  { %344 = vmatpush3.bf16.msra.mxu0 %v389_v3  ;;  %380 = vmatpush3.bf16.msra.mxu1 %v389_v3 }
  0x10   :  { %345 = vmatprep.subr.bf16.mxu0 %v390_v5  ;;  %373 = vmatprep.subr.bf16.mxu1 %v390_v5 }
  0x13   :  { %346 = vmatpush3.bf16.msra.mxu0 %v390_v5  ;;  %381 = vmatpush3.bf16.msra.mxu1 %v390_v5 }
  0x14   :  { %347 = vmatprep.subr.bf16.mxu0 %v391_v7  ;;  %374 = vmatprep.subr.bf16.mxu1 %v391_v7 }
  0x17   :  { %348 = vmatpush3.bf16.msra.mxu0 %v391_v7  ;;  %382 = vmatpush3.bf16.msra.mxu1 %v391_v7 }
  0x18   :  { %349 = vmatprep.subr.bf16.mxu0 %v392_v8  ;;  %375 = vmatprep.subr.bf16.mxu1 %v392_v8 }
  0x1b   :  { %350 = vmatpush3.bf16.msra.mxu0 %v392_v8  ;;  %383 = vmatpush3.bf16.msra.mxu1 %v392_v8 }
  0x1c   :  { %351 = vmatprep.subr.bf16.mxu0 %v393_v9  ;;  %376 = vmatprep.subr.bf16.mxu1 %v393_v9 }
  0x1f   :  { %352 = vmatpush3.bf16.msra.mxu0 %v393_v9  ;;  %384 = vmatpush3.bf16.msra.mxu1 %v393_v9 }
  0x22   :  { %354 = vmatmul.mubr.bf16.vlgmr.msra.gmra.mxu0 %v395_v10  ;;  %362 = vmatmul.mubr.bf16.vlgmr.msra.gmra.mxu1 %v399_v11 }
  0x23   :  { %357 = vmatprep.mubr.bf16.mxu0 %v396_v12  ;;  %365 = vmatprep.mubr.bf16.mxu1 %v400_v13 }
  0x2a   :  { %358 = vmatmul.mubr.bf16.gmra.mxu0 %v397_v14  ;;  %366 = vmatmul.mubr.bf16.gmra.mxu1 %v401_v15 }
  0xe2   :  { %v355_v16 = vpop.f32.mrf.mxu0  ;;  %v363_v17 = vpop.f32.mrf.mxu1 }
  0xe3   :  { %v266_v27 = vmul.f32 %v355_v16, %v355_v16  ;;  %v274_v58 = vmul.f32 %v363_v17, %v363_v17 }
  0xe4   :  { %v182_v18 = vpop.f32.mrf.mxu0  ;;  %v214_v20 = vpop.f32.mrf.mxu1 }
  0xe5   :  { %v264_v22 = vmul.f32 %v182_v18, %v182_v18  ;;  %v272_v51 = vmul.f32 %v214_v20, %v214_v20 }
  0xe6   :  { %v356_v19 = vpop.f32.mrf.mxu0  ;;  %v364_v26 = vpop.f32.mrf.mxu1 }
  0xe7   :  { %v267_v31 = vmul.f32 %v356_v19, %v356_v19  ;;  %v275_v61 = vmul.f32 %v364_v26, %v364_v26 }
  0xe8   :  { %v185_v21 = vpop.f32.mrf.mxu0  ;;  %v217_v35 = vpop.f32.mrf.mxu1 }
  0xe9   :  { %v246_v23 = vadd.f32 %v185_v21, %v182_v18  ;;  %v265_v24 = vmul.f32 %v185_v21, %v185_v21  ;;  %v273_v55 = vmul.f32 %v217_v35, %v217_v35 }
  0xea   :  { %v359_v25 = vpop.f32.mrf.mxu0  ;;  %v367_v43 = vpop.f32.mrf.mxu1 }
  0xeb   :  { %v247_v28 = vadd.f32 %v355_v16, %v246_v23  ;;  %v280_v29 = vadd.f32 %v265_v24, %v264_v22  ;;  %v270_v44 = vmul.f32 %v359_v25, %v359_v25  ;;  %v278_v7 = vmul.f32 %v367_v43, %v367_v43 }
  0xec   :  { %v198_v30 = vpop.f32.mrf.mxu0  ;;  %v230_v50 = vpop.f32.mrf.mxu1 }
  0xed   :  { %v281_v32 = vadd.f32 %v280_v29, %v266_v27  ;;  %v248_v33 = vadd.f32 %v356_v19, %v247_v28  ;;  %v268_v37 = vmul.f32 %v198_v30, %v198_v30  ;;  %v276_v2 = vmul.f32 %v230_v50, %v230_v50 }
  0xee   :  { %v360_v34 = vpop.f32.mrf.mxu0  ;;  %v368_v57 = vpop.f32.mrf.mxu1 }
  0xef   :  { %v249_v36 = vadd.f32 %v248_v33, %v198_v30  ;;  %v282_v38 = vadd.f32 %v281_v32, %v267_v31  ;;  %v271_v47 = vmul.f32 %v360_v34, %v360_v34  ;;  %v279_v10 = vmul.f32 %v368_v57, %v368_v57 }
  0xf0   :  { %v201_v39 = vpop.f32.mrf.mxu0  ;;  %v233_v0 = vpop.f32.mrf.mxu1 }
  0xf1   :  { %v283_v40 = vadd.f32 %v282_v38, %v268_v37  ;;  %v250_v41 = vadd.f32 %v249_v36, %v201_v39  ;;  %v269_v42 = vmul.f32 %v201_v39, %v201_v39  ;;  %v277_v6 = vmul.f32 %v233_v0, %v233_v0 }
  0xf3   :  { %v251_v45 = vadd.f32 %v359_v25, %v250_v41  ;;  %v284_v46 = vadd.f32 %v283_v40, %v269_v42 }
  0xf5   :  { %v252_v48 = vadd.f32 %v360_v34, %v251_v45  ;;  %v285_v49 = vadd.f32 %v284_v46, %v270_v44 }
  0xf7   :  { %v286_v52 = vadd.f32 %v285_v49, %v271_v47  ;;  %v253_v53 = vadd.f32 %v252_v48, %v214_v20 }
  0xf9   :  { %v254_v54 = vadd.f32 %v253_v53, %v217_v35  ;;  %v287_v56 = vadd.f32 %v286_v52, %v272_v51 }
  0xfb   :  { %v255_v59 = vadd.f32 %v363_v17, %v254_v54  ;;  %v288_v60 = vadd.f32 %v287_v56, %v273_v55 }
  0xfd   :  { %v289_v62 = vadd.f32 %v288_v60, %v274_v58  ;;  %v256_v63 = vadd.f32 %v364_v26, %v255_v59 }
  0xff   :  { %v257_v1 = vadd.f32 %v256_v63, %v230_v50  ;;  %v290_v3 = vadd.f32 %v289_v62, %v275_v61 }
 0x101   :  { %v291_v4 = vadd.f32 %v290_v3, %v276_v2  ;;  %v258_v5 = vadd.f32 %v257_v1, %v233_v0 }
 0x103   :  { %v259_v8 = vadd.f32 %v367_v43, %v258_v5  ;;  %v292_v9 = vadd.f32 %v291_v4, %v277_v6 }
 0x105   :  { %v260_v11 = vadd.f32 %v368_v57, %v259_v8  ;;  %v293_v12 = vadd.f32 %v292_v9, %v278_v7 }
 0x107   :  { %v294_v13 = vadd.f32 %v293_v12, %v279_v10  ;;  %262 = vst [vmem:[%s478_s2] sm:$0xff] %v260_v11 }
 0x109   :  { %296 = vst [vmem:[%s479_s3] sm:$0xff] %v294_v13 }

// kernel: up_forward.7
= control target key start
LH: loop header
LB: loop body
LE: loop exit
PB: predicated region body
PF: predicated region fallthrough
CT: control target
= control target key end

     0   :  { %s687_s1 = inlined_call_operand.vmem [shape: bf16[128,128], index: 1, kind: input, shape index: {}]   ;;  %s688_s0 = inlined_call_operand.vmem [shape: bf16[128,128], index: 0, kind: input, shape index: {}]   ;;  %s689_s2 = inlined_call_operand.vmem [shape: f32[1,128], index: 2, kind: input, shape index: {}]   ;;  %s690_s3 = inlined_call_operand.vmem [shape: f32[1,128], index: 3, kind: input, shape index: {}]   ;;  %s691_s4 = inlined_call_operand.vmem [shape: bf16[128,128], index: 4, kind: output, shape index: {}]  }
   0x1   :  { %v550_v0 = vld [vmem:[%s687_s1 + $0x38] sm:$0xff]   ;;  %v551_v1 = vld [vmem:[%s687_s1 + $0x30] sm:$0xff]   ;;  %v552_v2 = vld [vmem:[%s687_s1 + $0x28] sm:$0xff]  }
   0x2   :  { %502 = vmatprep.subr.bf16.mxu0 %v550_v0  ;;  %534 = vmatprep.subr.bf16.mxu1 %v550_v0  ;;  %v553_v3 = vld [vmem:[%s687_s1 + $0x20] sm:$0xff]   ;;  %v554_v6 = vld [vmem:[%s687_s1 + $0x18] sm:$0xff]   ;;  %v555_v7 = vld [vmem:[%s687_s1 + $0x10] sm:$0xff]  }
   0x3   :  { %503 = vmatpush3.bf16.msra.mxu0 %v550_v0  ;;  %542 = vmatpush3.bf16.msra.mxu1 %v550_v0  ;;  %v558_v4 = vld [vmem:[%s688_s0] sm:$0xff]   ;;  %v556_v8 = vld [vmem:[%s687_s1 + $0x8] sm:$0xff]   ;;  %v562_v12 = vld [vmem:[%s688_s0 + $0x10] sm:$0xff]  }
   0x4   :  { %504 = vmatprep.subr.bf16.mxu0 %v551_v1  ;;  %535 = vmatprep.subr.bf16.mxu1 %v551_v1  ;;  %v559_v5 = vld [vmem:[%s688_s0 + $0x20] sm:$0xff]   ;;  %v560_v10 = vld [vmem:[%s688_s0 + $0x8] sm:$0xff]   ;;  %v563_v13 = vld [vmem:[%s688_s0 + $0x30] sm:$0xff]  }
   0x5   :  { %518 = vmatprep.mubr.bf16.mxu0 %v558_v4  ;;  %526 = vmatprep.mubr.bf16.mxu1 %v559_v5  ;;  %v557_v9 = vld [vmem:[%s687_s1] sm:$0xff]   ;;  %v561_v11 = vld [vmem:[%s688_s0 + $0x28] sm:$0xff]   ;;  %v564_v14 = vld [vmem:[%s688_s0 + $0x18] sm:$0xff]  }
   0x6   :  { %v565_v15 = vld [vmem:[%s688_s0 + $0x38] sm:$0xff]   ;;  %v642_v16 = vld [vmem:[%s689_s2] ss:$0 sm:$0xff] }
   0x7   :  { %505 = vmatpush3.bf16.msra.mxu0 %v551_v1  ;;  %543 = vmatpush3.bf16.msra.mxu1 %v551_v1  ;;  %v406_v21 = vld [vmem:[%s690_s3] ss:$0 sm:$0xff] }
   0x8   :  { %506 = vmatprep.subr.bf16.mxu0 %v552_v2  ;;  %536 = vmatprep.subr.bf16.mxu1 %v552_v2 }
   0xb   :  { %507 = vmatpush3.bf16.msra.mxu0 %v552_v2  ;;  %544 = vmatpush3.bf16.msra.mxu1 %v552_v2 }
   0xc   :  { %508 = vmatprep.subr.bf16.mxu0 %v553_v3  ;;  %537 = vmatprep.subr.bf16.mxu1 %v553_v3 }
   0xf   :  { %509 = vmatpush3.bf16.msra.mxu0 %v553_v3  ;;  %545 = vmatpush3.bf16.msra.mxu1 %v553_v3 }
  0x10   :  { %510 = vmatprep.subr.bf16.mxu0 %v554_v6  ;;  %538 = vmatprep.subr.bf16.mxu1 %v554_v6 }
  0x13   :  { %511 = vmatpush3.bf16.msra.mxu0 %v554_v6  ;;  %546 = vmatpush3.bf16.msra.mxu1 %v554_v6 }
  0x14   :  { %512 = vmatprep.subr.bf16.mxu0 %v555_v7  ;;  %539 = vmatprep.subr.bf16.mxu1 %v555_v7 }
  0x17   :  { %513 = vmatpush3.bf16.msra.mxu0 %v555_v7  ;;  %547 = vmatpush3.bf16.msra.mxu1 %v555_v7 }
  0x18   :  { %514 = vmatprep.subr.bf16.mxu0 %v556_v8  ;;  %540 = vmatprep.subr.bf16.mxu1 %v556_v8 }
  0x1b   :  { %515 = vmatpush3.bf16.msra.mxu0 %v556_v8  ;;  %548 = vmatpush3.bf16.msra.mxu1 %v556_v8 }
  0x1c   :  { %516 = vmatprep.subr.bf16.mxu0 %v557_v9  ;;  %541 = vmatprep.subr.bf16.mxu1 %v557_v9 }
  0x1f   :  { %517 = vmatpush3.bf16.msra.mxu0 %v557_v9  ;;  %549 = vmatpush3.bf16.msra.mxu1 %v557_v9 }
  0x22   :  { %519 = vmatmul.mubr.bf16.vlgmr.msra.gmra.mxu0 %v560_v10  ;;  %527 = vmatmul.mubr.bf16.vlgmr.msra.gmra.mxu1 %v561_v11 }
  0x23   :  { %522 = vmatprep.mubr.bf16.mxu0 %v562_v12  ;;  %530 = vmatprep.mubr.bf16.mxu1 %v563_v13 }
  0x2a   :  { %523 = vmatmul.mubr.bf16.gmra.mxu0 %v564_v14  ;;  %531 = vmatmul.mubr.bf16.gmra.mxu1 %v565_v15 }
  0xe2   :  { %v520_v17 = vpop.f32.mrf.mxu0  ;;  %v528_v18 = vpop.f32.mrf.mxu1 }
  0xe3   :  { %v252_v19 = vmul.f32 %v520_v17, %v642_v16  ;;  %v260_v20 = vmul.f32 %v528_v18, %v642_v16 }
  0xe4   :  { %v180_v22 = vpop.f32.mrf.mxu0  ;;  %v212_v23 = vpop.f32.mrf.mxu1 }
  0xe5   :  { %v250_v24 = vmul.f32 %v642_v16, %v180_v22  ;;  %v258_v25 = vmul.f32 %v642_v16, %v212_v23  ;;  %v275_v28 = vadd.f32 %v406_v21, %v252_v19  ;;  %v283_v29 = vadd.f32 %v406_v21, %v260_v20 }
  0xe6   :  { %v521_v26 = vpop.f32.mrf.mxu0  ;;  %v529_v27 = vpop.f32.mrf.mxu1 }
  0xe7   :  { %v253_v30 = vmul.f32 %v521_v26, %v642_v16  ;;  %v261_v31 = vmul.f32 %v529_v27, %v642_v16  ;;  %v273_v34 = vadd.f32 %v406_v21, %v250_v24  ;;  %v281_v35 = vadd.f32 %v406_v21, %v258_v25 }
  0xe8   :  { %v183_v32 = vpop.f32.mrf.mxu0  ;;  %v215_v33 = vpop.f32.mrf.mxu1  ;;  %v291_v42 = vmax.f32 %v275_v28, 0.0  ;;  %v299_v43 = vmax.f32 %v283_v29, 0.0 }
  0xe9   :  { %v251_v36 = vmul.f32 %v642_v16, %v183_v32  ;;  %v259_v37 = vmul.f32 %v642_v16, %v215_v33  ;;  %v276_v38 = vadd.f32 %v406_v21, %v253_v30  ;;  %v284_v39 = vadd.f32 %v406_v21, %v261_v31 }
  0xea   :  { %v524_v40 = vpop.f32.mrf.mxu0  ;;  %v532_v41 = vpop.f32.mrf.mxu1  ;;  %v289_v52 = vmax.f32 %v273_v34, 0.0  ;;  %v297_v53 = vmax.f32 %v281_v35, 0.0 }
  0xeb   :  { %v274_v44 = vadd.f32 %v406_v21, %v251_v36  ;;  %v282_v45 = vadd.f32 %v406_v21, %v259_v37  ;;  %v292_v46 = vmax.f32 %v276_v38, 0.0  ;;  %v300_v47 = vmax.f32 %v284_v39, 0.0 }
  0xec   :  { %v256_v48 = vmul.f32 %v524_v40, %v642_v16  ;;  %v264_v49 = vmul.f32 %v532_v41, %v642_v16  ;;  %v196_v50 = vpop.f32.mrf.mxu0  ;;  %v228_v51 = vpop.f32.mrf.mxu1 }
  0xed   :  { %v290_v54 = vmax.f32 %v274_v44, 0.0  ;;  %v298_v55 = vmax.f32 %v282_v45, 0.0  ;;  %v447_v56 = vpack.c.bf16 %v292_v46, %v291_v42  ;;  %v467_v57 = vpack.c.bf16 %v300_v47, %v299_v43 }
  0xee   :  { %v254_v58 = vmul.f32 %v642_v16, %v196_v50  ;;  %v262_v59 = vmul.f32 %v642_v16, %v228_v51  ;;  %v525_v60 = vpop.f32.mrf.mxu0  ;;  %v533_v61 = vpop.f32.mrf.mxu1  ;;  %v279_v0 = vadd.f32 %v406_v21, %v256_v48  ;;  %v287_v1 = vadd.f32 %v406_v21, %v264_v49 }
  0xef   :  { %v442_v62 = vpack.c.bf16 %v290_v54, %v289_v52  ;;  %v462_v63 = vpack.c.bf16 %v298_v55, %v297_v53  ;;  %479 = vst [vmem:[%s691_s4 + $0x8] sm:$0xff] %v447_v56   ;;  %483 = vst [vmem:[%s691_s4 + $0x28] sm:$0xff] %v467_v57   ;;  %v257_v2 = vmul.f32 %v525_v60, %v642_v16 }
  0xf0   :  { %v265_v3 = vmul.f32 %v533_v61, %v642_v16  ;;  %v199_v4 = vpop.f32.mrf.mxu0  ;;  %v231_v5 = vpop.f32.mrf.mxu1  ;;  %v277_v6 = vadd.f32 %v406_v21, %v254_v58  ;;  %v285_v7 = vadd.f32 %v406_v21, %v262_v59  ;;  %v295_v14 = vmax.f32 %v279_v0, 0.0 }
  0xf1   :  { %443 = vst [vmem:[%s691_s4] sm:$0xff] %v442_v62   ;;  %482 = vst [vmem:[%s691_s4 + $0x20] sm:$0xff] %v462_v63   ;;  %v255_v8 = vmul.f32 %v642_v16, %v199_v4  ;;  %v263_v9 = vmul.f32 %v642_v16, %v231_v5  ;;  %v280_v10 = vadd.f32 %v406_v21, %v257_v2  ;;  %v303_v15 = vmax.f32 %v287_v1, 0.0 }
  0xf2   :  { %v288_v11 = vadd.f32 %v406_v21, %v265_v3  ;;  %v293_v19 = vmax.f32 %v277_v6, 0.0  ;;  %v301_v20 = vmax.f32 %v285_v7, 0.0 }
  0xf3   :  { %v278_v12 = vadd.f32 %v406_v21, %v255_v8  ;;  %v286_v13 = vadd.f32 %v406_v21, %v263_v9  ;;  %v296_v17 = vmax.f32 %v280_v10, 0.0 }
  0xf4   :  { %v304_v18 = vmax.f32 %v288_v11, 0.0 }
  0xf5   :  { %v294_v22 = vmax.f32 %v278_v12, 0.0  ;;  %v302_v23 = vmax.f32 %v286_v13, 0.0  ;;  %v457_v24 = vpack.c.bf16 %v296_v17, %v295_v14 }
  0xf6   :  { %v477_v25 = vpack.c.bf16 %v304_v18, %v303_v15 }
  0xf7   :  { %v452_v26 = vpack.c.bf16 %v294_v22, %v293_v19  ;;  %v472_v27 = vpack.c.bf16 %v302_v23, %v301_v20  ;;  %481 = vst [vmem:[%s691_s4 + $0x18] sm:$0xff] %v457_v24  }
  0xf8   :  { %485 = vst [vmem:[%s691_s4 + $0x38] sm:$0xff] %v477_v25  }
  0xf9   :  { %480 = vst [vmem:[%s691_s4 + $0x10] sm:$0xff] %v452_v26   ;;  %484 = vst [vmem:[%s691_s4 + $0x30] sm:$0xff] %v472_v27  }

// kernel: up_forward.9
= control target key start
LH: loop header
LB: loop body
LE: loop exit
PB: predicated region body
PF: predicated region fallthrough
CT: control target
= control target key end

     0   :  { %s1502_s0 = inlined_call_operand.vmem [shape: bf16[512,128], index: 0, kind: input, shape index: {}]   ;;  %s1503_s1 = inlined_call_operand.vmem [shape: f32[1,128], index: 1, kind: input, shape index: {}]   ;;  %s1504_s2 = inlined_call_operand.vmem [shape: f32[1,128], index: 2, kind: input, shape index: {}]   ;;  %s1505_s3 = inlined_call_operand.vmem [shape: bf16[512,128], index: 3, kind: output, shape index: {}]  }
   0x1   :  { %v803_v0 = vld [vmem:[%s1502_s0] sm:$0xff]   ;;  %v1090_v4 = vld [vmem:[%s1502_s0 + $0x8] sm:$0xff]   ;;  %v1091_v5 = vld [vmem:[%s1502_s0 + $0x10] sm:$0xff]  }
   0x2   :  { %v1178_v1 = vld [vmem:[%s1503_s1] ss:$0 sm:$0xff]  ;;  %v804_v2 = vunpack.c.l.bf16 %v803_v0  ;;  %v805_v3 = vunpack.c.h.bf16 %v803_v0  ;;  %v1092_v6 = vld [vmem:[%s1502_s0 + $0x18] sm:$0xff]   ;;  %v808_v8 = vunpack.c.l.bf16 %v1090_v4  ;;  %v809_v9 = vunpack.c.h.bf16 %v1090_v4  ;;  %v1094_v33 = vld [vmem:[%s1502_s0 + $0x28] sm:$0xff]  }
   0x3   :  { %v1192_v7 = vld [vmem:[%s1504_s2] ss:$0 sm:$0xff]  ;;  %v812_v10 = vunpack.c.l.bf16 %v1091_v5  ;;  %v813_v11 = vunpack.c.h.bf16 %v1091_v5  ;;  %v816_v14 = vunpack.c.l.bf16 %v1092_v6  ;;  %v817_v15 = vunpack.c.h.bf16 %v1092_v6  ;;  %v1095_v38 = vld [vmem:[%s1502_s0 + $0x30] sm:$0xff]   ;;  %v1096_v43 = vld [vmem:[%s1502_s0 + $0x38] sm:$0xff]  }
   0x4   :  { %v149_v12 = vmul.f32 %v804_v2, %v1178_v1  ;;  %v150_v13 = vmul.f32 %v805_v3, %v1178_v1  ;;  %v151_v16 = vmul.f32 %v808_v8, %v1178_v1  ;;  %v152_v17 = vmul.f32 %v809_v9, %v1178_v1  ;;  %v1093_v28 = vld [vmem:[%s1502_s0 + $0x20] sm:$0xff]  }
   0x5   :  { %v153_v18 = vmul.f32 %v812_v10, %v1178_v1  ;;  %v154_v19 = vmul.f32 %v813_v11, %v1178_v1  ;;  %v155_v22 = vmul.f32 %v816_v14, %v1178_v1  ;;  %v156_v23 = vmul.f32 %v817_v15, %v1178_v1  ;;  %v1097_v0 = vld [vmem:[%s1502_s0 + $0x40] sm:$0xff]   ;;  %v1098_v11 = vld [vmem:[%s1502_s0 + $0x48] sm:$0xff]  }
   0x6   :  { %v220_v20 = vadd.f32 %v1192_v7, %v149_v12  ;;  %v221_v21 = vadd.f32 %v1192_v7, %v150_v13  ;;  %v222_v24 = vadd.f32 %v1192_v7, %v151_v16  ;;  %v223_v25 = vadd.f32 %v1192_v7, %v152_v17  ;;  %v1099_v16 = vld [vmem:[%s1502_s0 + $0x50] sm:$0xff]  }
   0x7   :  { %v224_v26 = vadd.f32 %v1192_v7, %v153_v18  ;;  %v225_v27 = vadd.f32 %v1192_v7, %v154_v19  ;;  %v226_v31 = vadd.f32 %v1192_v7, %v155_v22  ;;  %v227_v32 = vadd.f32 %v1192_v7, %v156_v23 }
   0x8   :  { %v284_v29 = vmax.f32 %v220_v20, 0.0  ;;  %v285_v30 = vmax.f32 %v221_v21, 0.0  ;;  %v286_v34 = vmax.f32 %v222_v24, 0.0  ;;  %v287_v35 = vmax.f32 %v223_v25, 0.0  ;;  %v1100_v25 = vld [vmem:[%s1502_s0 + $0x58] sm:$0xff]  }
   0x9   :  { %v288_v36 = vmax.f32 %v224_v26, 0.0  ;;  %v289_v37 = vmax.f32 %v225_v27, 0.0  ;;  %v290_v40 = vmax.f32 %v226_v31, 0.0  ;;  %v291_v41 = vmax.f32 %v227_v32, 0.0 }
   0xa   :  { %v933_v39 = vpack.c.bf16 %v285_v30, %v284_v29  ;;  %v820_v42 = vunpack.c.l.bf16 %v1093_v28  ;;  %v938_v44 = vpack.c.bf16 %v287_v35, %v286_v34  ;;  %v821_v46 = vunpack.c.h.bf16 %v1093_v28 }
   0xb   :  { %v943_v45 = vpack.c.bf16 %v289_v37, %v288_v36  ;;  %v824_v47 = vunpack.c.l.bf16 %v1094_v33  ;;  %v948_v48 = vpack.c.bf16 %v291_v41, %v290_v40  ;;  %v825_v50 = vunpack.c.h.bf16 %v1094_v33 }
   0xc   :  { %934 = vst [vmem:[%s1505_s3] sm:$0xff] %v933_v39   ;;  %v157_v49 = vmul.f32 %v820_v42, %v1178_v1  ;;  %v828_v51 = vunpack.c.l.bf16 %v1095_v38  ;;  %1121 = vst [vmem:[%s1505_s3 + $0x8] sm:$0xff] %v938_v44   ;;  %v158_v52 = vmul.f32 %v821_v46, %v1178_v1  ;;  %v829_v54 = vunpack.c.h.bf16 %v1095_v38  ;;  %v1101_v38 = vld [vmem:[%s1502_s0 + $0x60] sm:$0xff]  }
   0xd   :  { %1122 = vst [vmem:[%s1505_s3 + $0x10] sm:$0xff] %v943_v45   ;;  %v159_v53 = vmul.f32 %v824_v47, %v1178_v1  ;;  %v832_v55 = vunpack.c.l.bf16 %v1096_v43  ;;  %1123 = vst [vmem:[%s1505_s3 + $0x18] sm:$0xff] %v948_v48   ;;  %v160_v57 = vmul.f32 %v825_v50, %v1178_v1  ;;  %v833_v59 = vunpack.c.h.bf16 %v1096_v43 }
   0xe   :  { %v228_v56 = vadd.f32 %v1192_v7, %v157_v49  ;;  %v161_v58 = vmul.f32 %v828_v51, %v1178_v1  ;;  %v229_v60 = vadd.f32 %v1192_v7, %v158_v52  ;;  %v162_v62 = vmul.f32 %v829_v54, %v1178_v1  ;;  %v1102_v51 = vld [vmem:[%s1502_s0 + $0x68] sm:$0xff]  }
   0xf   :  { %v230_v61 = vadd.f32 %v1192_v7, %v159_v53  ;;  %v163_v63 = vmul.f32 %v832_v55, %v1178_v1  ;;  %v231_v3 = vadd.f32 %v1192_v7, %v160_v57  ;;  %v164_v5 = vmul.f32 %v833_v59, %v1178_v1 }
  0x10   :  { %v292_v2 = vmax.f32 %v228_v56, 0.0  ;;  %v232_v4 = vadd.f32 %v1192_v7, %v161_v58  ;;  %v293_v6 = vmax.f32 %v229_v60, 0.0  ;;  %v233_v9 = vadd.f32 %v1192_v7, %v162_v62  ;;  %v1103_v60 = vld [vmem:[%s1502_s0 + $0x70] sm:$0xff]  }
  0x11   :  { %v294_v8 = vmax.f32 %v230_v61, 0.0  ;;  %v234_v10 = vadd.f32 %v1192_v7, %v163_v63  ;;  %v295_v12 = vmax.f32 %v231_v3, 0.0  ;;  %v235_v14 = vadd.f32 %v1192_v7, %v164_v5 }
  0x12   :  { %v296_v13 = vmax.f32 %v232_v4, 0.0  ;;  %v836_v15 = vunpack.c.l.bf16 %v1097_v0  ;;  %v953_v17 = vpack.c.bf16 %v293_v6, %v292_v2  ;;  %v297_v18 = vmax.f32 %v233_v9, 0.0  ;;  %v1104_v2 = vld [vmem:[%s1502_s0 + $0x78] sm:$0xff]  }
  0x13   :  { %v298_v19 = vmax.f32 %v234_v10, 0.0  ;;  %v837_v20 = vunpack.c.h.bf16 %v1097_v0  ;;  %v958_v21 = vpack.c.bf16 %v295_v12, %v294_v8  ;;  %v299_v22 = vmax.f32 %v235_v14, 0.0  ;;  %v1105_v12 = vld [vmem:[%s1502_s0 + $0x80] sm:$0xff]  }
  0x14   :  { %v165_v23 = vmul.f32 %v836_v15, %v1178_v1  ;;  %v840_v24 = vunpack.c.l.bf16 %v1098_v11  ;;  %1124 = vst [vmem:[%s1505_s3 + $0x20] sm:$0xff] %v953_v17   ;;  %v963_v26 = vpack.c.bf16 %v297_v18, %v296_v13  ;;  %v841_v28 = vunpack.c.h.bf16 %v1098_v11 }
  0x15   :  { %v166_v27 = vmul.f32 %v837_v20, %v1178_v1  ;;  %v844_v29 = vunpack.c.l.bf16 %v1099_v16  ;;  %1125 = vst [vmem:[%s1505_s3 + $0x28] sm:$0xff] %v958_v21   ;;  %v968_v30 = vpack.c.bf16 %v299_v22, %v298_v19  ;;  %v845_v33 = vunpack.c.h.bf16 %v1099_v16 }
  0x16   :  { %v236_v31 = vadd.f32 %v1192_v7, %v165_v23  ;;  %v167_v32 = vmul.f32 %v840_v24, %v1178_v1  ;;  %1126 = vst [vmem:[%s1505_s3 + $0x30] sm:$0xff] %v963_v26   ;;  %v168_v35 = vmul.f32 %v841_v28, %v1178_v1  ;;  %v848_v37 = vunpack.c.l.bf16 %v1100_v25 }
  0x17   :  { %v237_v34 = vadd.f32 %v1192_v7, %v166_v27  ;;  %v169_v36 = vmul.f32 %v844_v29, %v1178_v1  ;;  %1127 = vst [vmem:[%s1505_s3 + $0x38] sm:$0xff] %v968_v30   ;;  %v170_v41 = vmul.f32 %v845_v33, %v1178_v1  ;;  %v849_v42 = vunpack.c.h.bf16 %v1100_v25  ;;  %v1106_v29 = vld [vmem:[%s1502_s0 + $0x88] sm:$0xff]  }
  0x18   :  { %v300_v39 = vmax.f32 %v236_v31, 0.0  ;;  %v238_v40 = vadd.f32 %v1192_v7, %v167_v32  ;;  %v239_v44 = vadd.f32 %v1192_v7, %v168_v35  ;;  %v171_v46 = vmul.f32 %v848_v37, %v1178_v1 }
  0x19   :  { %v301_v43 = vmax.f32 %v237_v34, 0.0  ;;  %v240_v45 = vadd.f32 %v1192_v7, %v169_v36  ;;  %v241_v48 = vadd.f32 %v1192_v7, %v170_v41  ;;  %v172_v49 = vmul.f32 %v849_v42, %v1178_v1  ;;  %v1107_v34 = vld [vmem:[%s1502_s0 + $0x90] sm:$0xff]  }
  0x1a   :  { %v302_v47 = vmax.f32 %v238_v40, 0.0  ;;  %v852_v50 = vunpack.c.l.bf16 %v1101_v38  ;;  %v303_v53 = vmax.f32 %v239_v44, 0.0  ;;  %v242_v55 = vadd.f32 %v1192_v7, %v171_v46 }
  0x1b   :  { %v973_v52 = vpack.c.bf16 %v301_v43, %v300_v39  ;;  %v304_v54 = vmax.f32 %v240_v45, 0.0  ;;  %v305_v56 = vmax.f32 %v241_v48, 0.0  ;;  %v243_v57 = vadd.f32 %v1192_v7, %v172_v49  ;;  %v1108_v43 = vld [vmem:[%s1502_s0 + $0x98] sm:$0xff]  }
  0x1c   :  { %v853_v58 = vunpack.c.h.bf16 %v1101_v38  ;;  %v173_v59 = vmul.f32 %v852_v50, %v1178_v1  ;;  %v978_v61 = vpack.c.bf16 %v303_v53, %v302_v47  ;;  %v306_v62 = vmax.f32 %v242_v55, 0.0 }
  0x1d   :  { %1128 = vst [vmem:[%s1505_s3 + $0x40] sm:$0xff] %v973_v52   ;;  %v856_v63 = vunpack.c.l.bf16 %v1102_v51  ;;  %v857_v0 = vunpack.c.h.bf16 %v1102_v51  ;;  %v983_v3 = vpack.c.bf16 %v305_v56, %v304_v54  ;;  %v307_v4 = vmax.f32 %v243_v57, 0.0  ;;  %v1109_v56 = vld [vmem:[%s1502_s0 + $0xa0] sm:$0xff]  }
  0x1e   :  { %v174_v5 = vmul.f32 %v853_v58, %v1178_v1  ;;  %v244_v6 = vadd.f32 %v1192_v7, %v173_v59  ;;  %1129 = vst [vmem:[%s1505_s3 + $0x48] sm:$0xff] %v978_v61   ;;  %v860_v10 = vunpack.c.l.bf16 %v1103_v60  ;;  %v861_v11 = vunpack.c.h.bf16 %v1103_v60 }
  0x1f   :  { %v175_v8 = vmul.f32 %v856_v63, %v1178_v1  ;;  %v176_v9 = vmul.f32 %v857_v0, %v1178_v1  ;;  %1130 = vst [vmem:[%s1505_s3 + $0x50] sm:$0xff] %v983_v3   ;;  %v988_v13 = vpack.c.bf16 %v307_v4, %v306_v62  ;;  %v864_v16 = vunpack.c.l.bf16 %v1104_v2 }
  0x20   :  { %v245_v14 = vadd.f32 %v1192_v7, %v174_v5  ;;  %v308_v15 = vmax.f32 %v244_v6, 0.0  ;;  %v177_v19 = vmul.f32 %v860_v10, %v1178_v1  ;;  %v178_v20 = vmul.f32 %v861_v11, %v1178_v1 }
  0x21   :  { %v246_v17 = vadd.f32 %v1192_v7, %v175_v8  ;;  %v247_v18 = vadd.f32 %v1192_v7, %v176_v9  ;;  %1131 = vst [vmem:[%s1505_s3 + $0x58] sm:$0xff] %v988_v13   ;;  %v865_v22 = vunpack.c.h.bf16 %v1104_v2  ;;  %v179_v23 = vmul.f32 %v864_v16, %v1178_v1  ;;  %v1110_v2 = vld [vmem:[%s1502_s0 + $0xa8] sm:$0xff]   ;;  %v1111_v16 = vld [vmem:[%s1502_s0 + $0xb0] sm:$0xff]  }
  0x22   :  { %v309_v21 = vmax.f32 %v245_v14, 0.0  ;;  %v868_v24 = vunpack.c.l.bf16 %v1105_v12  ;;  %v248_v27 = vadd.f32 %v1192_v7, %v177_v19  ;;  %v249_v28 = vadd.f32 %v1192_v7, %v178_v20 }
  0x23   :  { %v310_v25 = vmax.f32 %v246_v17, 0.0  ;;  %v311_v26 = vmax.f32 %v247_v18, 0.0  ;;  %v180_v31 = vmul.f32 %v865_v22, %v1178_v1  ;;  %v250_v32 = vadd.f32 %v1192_v7, %v179_v23 }
  0x24   :  { %v993_v30 = vpack.c.bf16 %v309_v21, %v308_v15  ;;  %v869_v33 = vunpack.c.h.bf16 %v1105_v12  ;;  %v312_v36 = vmax.f32 %v248_v27, 0.0  ;;  %v313_v37 = vmax.f32 %v249_v28, 0.0  ;;  %v1112_v21 = vld [vmem:[%s1502_s0 + $0xb8] sm:$0xff]  }
  0x25   :  { %v998_v35 = vpack.c.bf16 %v311_v26, %v310_v25  ;;  %v181_v38 = vmul.f32 %v868_v24, %v1178_v1  ;;  %v251_v39 = vadd.f32 %v1192_v7, %v180_v31  ;;  %v314_v40 = vmax.f32 %v250_v32, 0.0 }
  0x26   :  { %1132 = vst [vmem:[%s1505_s3 + $0x60] sm:$0xff] %v993_v30   ;;  %v182_v41 = vmul.f32 %v869_v33, %v1178_v1  ;;  %v872_v42 = vunpack.c.l.bf16 %v1106_v29  ;;  %v1003_v44 = vpack.c.bf16 %v313_v37, %v312_v36  ;;  %v873_v46 = vunpack.c.h.bf16 %v1106_v29 }
  0x27   :  { %1133 = vst [vmem:[%s1505_s3 + $0x68] sm:$0xff] %v998_v35   ;;  %v252_v45 = vadd.f32 %v1192_v7, %v181_v38  ;;  %v876_v47 = vunpack.c.l.bf16 %v1107_v34  ;;  %v315_v48 = vmax.f32 %v251_v39, 0.0  ;;  %v877_v51 = vunpack.c.h.bf16 %v1107_v34  ;;  %v1113_v34 = vld [vmem:[%s1502_s0 + $0xc0] sm:$0xff]  }
  0x28   :  { %v253_v49 = vadd.f32 %v1192_v7, %v182_v41  ;;  %v183_v50 = vmul.f32 %v872_v42, %v1178_v1  ;;  %1134 = vst [vmem:[%s1505_s3 + $0x70] sm:$0xff] %v1003_v44   ;;  %v184_v53 = vmul.f32 %v873_v46, %v1178_v1  ;;  %v880_v55 = vunpack.c.l.bf16 %v1108_v43 }
  0x29   :  { %v316_v52 = vmax.f32 %v252_v45, 0.0  ;;  %v185_v54 = vmul.f32 %v876_v47, %v1178_v1  ;;  %v1008_v57 = vpack.c.bf16 %v315_v48, %v314_v40  ;;  %v186_v60 = vmul.f32 %v877_v51, %v1178_v1  ;;  %v1114_v47 = vld [vmem:[%s1502_s0 + $0xc8] sm:$0xff]  }
  0x2a   :  { %v317_v58 = vmax.f32 %v253_v49, 0.0  ;;  %v254_v59 = vadd.f32 %v1192_v7, %v183_v50  ;;  %v255_v61 = vadd.f32 %v1192_v7, %v184_v53  ;;  %v881_v63 = vunpack.c.h.bf16 %v1108_v43 }
  0x2b   :  { %v256_v62 = vadd.f32 %v1192_v7, %v185_v54  ;;  %v187_v0 = vmul.f32 %v880_v55, %v1178_v1  ;;  %1135 = vst [vmem:[%s1505_s3 + $0x78] sm:$0xff] %v1008_v57   ;;  %v257_v5 = vadd.f32 %v1192_v7, %v186_v60  ;;  %v884_v6 = vunpack.c.l.bf16 %v1109_v56 }
  0x2c   :  { %v1013_v3 = vpack.c.bf16 %v317_v58, %v316_v52  ;;  %v318_v4 = vmax.f32 %v254_v59, 0.0  ;;  %v319_v8 = vmax.f32 %v255_v61, 0.0  ;;  %v188_v10 = vmul.f32 %v881_v63, %v1178_v1  ;;  %v1115_v52 = vld [vmem:[%s1502_s0 + $0xd0] sm:$0xff]   ;;  %v1116_v61 = vld [vmem:[%s1502_s0 + $0xd8] sm:$0xff]  }
  0x2d   :  { %v320_v9 = vmax.f32 %v256_v62, 0.0  ;;  %v258_v11 = vadd.f32 %v1192_v7, %v187_v0  ;;  %v321_v12 = vmax.f32 %v257_v5, 0.0  ;;  %v885_v13 = vunpack.c.h.bf16 %v1109_v56 }
  0x2e   :  { %1136 = vst [vmem:[%s1505_s3 + $0x80] sm:$0xff] %v1013_v3   ;;  %v189_v14 = vmul.f32 %v884_v6, %v1178_v1  ;;  %v888_v15 = vunpack.c.l.bf16 %v1110_v2  ;;  %v1018_v17 = vpack.c.bf16 %v319_v8, %v318_v4  ;;  %v259_v18 = vadd.f32 %v1192_v7, %v188_v10 }
  0x2f   :  { %v322_v19 = vmax.f32 %v258_v11, 0.0  ;;  %v889_v20 = vunpack.c.h.bf16 %v1110_v2  ;;  %v1023_v22 = vpack.c.bf16 %v321_v12, %v320_v9  ;;  %v190_v23 = vmul.f32 %v885_v13, %v1178_v1  ;;  %v1117_v12 = vld [vmem:[%s1502_s0 + $0xe0] sm:$0xff]  }
  0x30   :  { %v260_v24 = vadd.f32 %v1192_v7, %v189_v14  ;;  %v191_v25 = vmul.f32 %v888_v15, %v1178_v1  ;;  %1137 = vst [vmem:[%s1505_s3 + $0x88] sm:$0xff] %v1018_v17   ;;  %v323_v26 = vmax.f32 %v259_v18, 0.0  ;;  %v892_v28 = vunpack.c.l.bf16 %v1111_v16 }
  0x31   :  { %v192_v27 = vmul.f32 %v889_v20, %v1178_v1  ;;  %v893_v29 = vunpack.c.h.bf16 %v1111_v16  ;;  %1138 = vst [vmem:[%s1505_s3 + $0x90] sm:$0xff] %v1023_v22   ;;  %v261_v30 = vadd.f32 %v1192_v7, %v190_v23  ;;  %v896_v33 = vunpack.c.l.bf16 %v1112_v21 }
  0x32   :  { %v324_v31 = vmax.f32 %v260_v24, 0.0  ;;  %v262_v32 = vadd.f32 %v1192_v7, %v191_v25  ;;  %v1028_v35 = vpack.c.bf16 %v323_v26, %v322_v19  ;;  %v193_v37 = vmul.f32 %v892_v28, %v1178_v1 }
  0x33   :  { %v263_v36 = vadd.f32 %v1192_v7, %v192_v27  ;;  %v194_v38 = vmul.f32 %v893_v29, %v1178_v1  ;;  %v325_v39 = vmax.f32 %v261_v30, 0.0  ;;  %v897_v41 = vunpack.c.h.bf16 %v1112_v21  ;;  %v1118_v21 = vld [vmem:[%s1502_s0 + $0xe8] sm:$0xff]  }
  0x34   :  { %v326_v40 = vmax.f32 %v262_v32, 0.0  ;;  %v195_v42 = vmul.f32 %v896_v33, %v1178_v1  ;;  %1139 = vst [vmem:[%s1505_s3 + $0x98] sm:$0xff] %v1028_v35   ;;  %v264_v44 = vadd.f32 %v1192_v7, %v193_v37  ;;  %v900_v46 = vunpack.c.l.bf16 %v1113_v34 }
  0x35   :  { %v327_v43 = vmax.f32 %v263_v36, 0.0  ;;  %v265_v45 = vadd.f32 %v1192_v7, %v194_v38  ;;  %v1033_v48 = vpack.c.bf16 %v325_v39, %v324_v31  ;;  %v196_v49 = vmul.f32 %v897_v41, %v1178_v1  ;;  %v1120_v39 = vld [vmem:[%s1502_s0 + $0xf8] sm:$0xff]  }
  0x36   :  { %v266_v50 = vadd.f32 %v1192_v7, %v195_v42  ;;  %v901_v51 = vunpack.c.h.bf16 %v1113_v34  ;;  %v328_v54 = vmax.f32 %v264_v44, 0.0  ;;  %v197_v56 = vmul.f32 %v900_v46, %v1178_v1  ;;  %v1119_v34 = vld [vmem:[%s1502_s0 + $0xf0] sm:$0xff]  }
  0x37   :  { %v1038_v53 = vpack.c.bf16 %v327_v43, %v326_v40  ;;  %v329_v55 = vmax.f32 %v265_v45, 0.0  ;;  %1140 = vst [vmem:[%s1505_s3 + $0xa0] sm:$0xff] %v1033_v48   ;;  %v267_v57 = vadd.f32 %v1192_v7, %v196_v49  ;;  %v904_v60 = vunpack.c.l.bf16 %v1114_v47 }
  0x38   :  { %v330_v58 = vmax.f32 %v266_v50, 0.0  ;;  %v198_v59 = vmul.f32 %v901_v51, %v1178_v1  ;;  %v268_v63 = vadd.f32 %v1192_v7, %v197_v56  ;;  %v905_v0 = vunpack.c.h.bf16 %v1114_v47 }
  0x39   :  { %1141 = vst [vmem:[%s1505_s3 + $0xa8] sm:$0xff] %v1038_v53   ;;  %v1043_v62 = vpack.c.bf16 %v329_v55, %v328_v54  ;;  %v908_v2 = vunpack.c.l.bf16 %v1115_v52  ;;  %v331_v3 = vmax.f32 %v267_v57, 0.0  ;;  %v199_v5 = vmul.f32 %v904_v60, %v1178_v1 }
  0x3a   :  { %v269_v4 = vadd.f32 %v1192_v7, %v198_v59  ;;  %v909_v6 = vunpack.c.h.bf16 %v1115_v52  ;;  %v332_v8 = vmax.f32 %v268_v63, 0.0  ;;  %v200_v9 = vmul.f32 %v905_v0, %v1178_v1 }
  0x3b   :  { %1142 = vst [vmem:[%s1505_s3 + $0xb0] sm:$0xff] %v1043_v62   ;;  %v201_v10 = vmul.f32 %v908_v2, %v1178_v1  ;;  %v912_v11 = vunpack.c.l.bf16 %v1116_v61  ;;  %v1048_v13 = vpack.c.bf16 %v331_v3, %v330_v58  ;;  %v270_v15 = vadd.f32 %v1192_v7, %v199_v5 }
  0x3c   :  { %v333_v14 = vmax.f32 %v269_v4, 0.0  ;;  %v202_v16 = vmul.f32 %v909_v6, %v1178_v1  ;;  %v271_v17 = vadd.f32 %v1192_v7, %v200_v9  ;;  %v913_v19 = vunpack.c.h.bf16 %v1116_v61 }
  0x3d   :  { %v272_v18 = vadd.f32 %v1192_v7, %v201_v10  ;;  %v203_v20 = vmul.f32 %v912_v11, %v1178_v1  ;;  %1143 = vst [vmem:[%s1505_s3 + $0xb8] sm:$0xff] %v1048_v13   ;;  %v334_v23 = vmax.f32 %v270_v15, 0.0  ;;  %v916_v25 = vunpack.c.l.bf16 %v1117_v12 }
  0x3e   :  { %v1053_v22 = vpack.c.bf16 %v333_v14, %v332_v8  ;;  %v273_v24 = vadd.f32 %v1192_v7, %v202_v16  ;;  %v335_v26 = vmax.f32 %v271_v17, 0.0  ;;  %v204_v28 = vmul.f32 %v913_v19, %v1178_v1 }
  0x3f   :  { %v336_v27 = vmax.f32 %v272_v18, 0.0  ;;  %v274_v29 = vadd.f32 %v1192_v7, %v203_v20  ;;  %v917_v31 = vunpack.c.h.bf16 %v1117_v12  ;;  %v205_v32 = vmul.f32 %v916_v25, %v1178_v1 }
  0x40   :  { %1144 = vst [vmem:[%s1505_s3 + $0xc0] sm:$0xff] %v1053_v22   ;;  %v337_v30 = vmax.f32 %v273_v24, 0.0  ;;  %v920_v33 = vunpack.c.l.bf16 %v1118_v21  ;;  %v1058_v35 = vpack.c.bf16 %v335_v26, %v334_v23  ;;  %v275_v36 = vadd.f32 %v1192_v7, %v204_v28 }
  0x41   :  { %v338_v37 = vmax.f32 %v274_v29, 0.0  ;;  %v921_v38 = vunpack.c.h.bf16 %v1118_v21  ;;  %v206_v41 = vmul.f32 %v917_v31, %v1178_v1  ;;  %v276_v42 = vadd.f32 %v1192_v7, %v205_v32 }
  0x42   :  { %v1063_v40 = vpack.c.bf16 %v337_v30, %v336_v27  ;;  %v207_v43 = vmul.f32 %v920_v33, %v1178_v1  ;;  %1145 = vst [vmem:[%s1505_s3 + $0xc8] sm:$0xff] %v1058_v35   ;;  %v339_v44 = vmax.f32 %v275_v36, 0.0  ;;  %v924_v46 = vunpack.c.l.bf16 %v1119_v34 }
  0x43   :  { %v208_v45 = vmul.f32 %v921_v38, %v1178_v1  ;;  %v925_v47 = vunpack.c.h.bf16 %v1119_v34  ;;  %v277_v48 = vadd.f32 %v1192_v7, %v206_v41  ;;  %v340_v49 = vmax.f32 %v276_v42, 0.0 }
  0x44   :  { %1146 = vst [vmem:[%s1505_s3 + $0xd0] sm:$0xff] %v1063_v40   ;;  %v278_v50 = vadd.f32 %v1192_v7, %v207_v43  ;;  %v928_v51 = vunpack.c.l.bf16 %v1120_v39  ;;  %v1068_v52 = vpack.c.bf16 %v339_v44, %v338_v37  ;;  %v209_v54 = vmul.f32 %v924_v46, %v1178_v1 }
  0x45   :  { %v279_v53 = vadd.f32 %v1192_v7, %v208_v45  ;;  %v210_v55 = vmul.f32 %v925_v47, %v1178_v1  ;;  %v341_v56 = vmax.f32 %v277_v48, 0.0  ;;  %v929_v58 = vunpack.c.h.bf16 %v1120_v39 }
  0x46   :  { %v342_v57 = vmax.f32 %v278_v50, 0.0  ;;  %v211_v59 = vmul.f32 %v928_v51, %v1178_v1  ;;  %1147 = vst [vmem:[%s1505_s3 + $0xd8] sm:$0xff] %v1068_v52   ;;  %v280_v61 = vadd.f32 %v1192_v7, %v209_v54 }
  0x47   :  { %v343_v60 = vmax.f32 %v279_v53, 0.0  ;;  %v281_v62 = vadd.f32 %v1192_v7, %v210_v55  ;;  %v1073_v63 = vpack.c.bf16 %v341_v56, %v340_v49  ;;  %v212_v0 = vmul.f32 %v929_v58, %v1178_v1 }
  0x48   :  { %v282_v2 = vadd.f32 %v1192_v7, %v211_v59  ;;  %v344_v4 = vmax.f32 %v280_v61, 0.0 }
  0x49   :  { %v1078_v3 = vpack.c.bf16 %v343_v60, %v342_v57  ;;  %v345_v5 = vmax.f32 %v281_v62, 0.0  ;;  %1148 = vst [vmem:[%s1505_s3 + $0xe0] sm:$0xff] %v1073_v63   ;;  %v283_v6 = vadd.f32 %v1192_v7, %v212_v0 }
  0x4a   :  { %v346_v8 = vmax.f32 %v282_v2, 0.0 }
  0x4b   :  { %1149 = vst [vmem:[%s1505_s3 + $0xe8] sm:$0xff] %v1078_v3   ;;  %v1083_v9 = vpack.c.bf16 %v345_v5, %v344_v4  ;;  %v347_v10 = vmax.f32 %v283_v6, 0.0 }
  0x4d   :  { %1150 = vst [vmem:[%s1505_s3 + $0xf0] sm:$0xff] %v1083_v9   ;;  %v1088_v1 = vpack.c.bf16 %v347_v10, %v346_v8 }
  0x4f   :  { %1151 = vst [vmem:[%s1505_s3 + $0xf8] sm:$0xff] %v1088_v1  }

// kernel: up_forward.8
= control target key start
LH: loop header
LB: loop body
LE: loop exit
PB: predicated region body
PF: predicated region fallthrough
CT: control target
= control target key end

     0   :  { %s2133_s1 = inlined_call_operand.vmem [shape: bf16[128,128], index: 1, kind: input, shape index: {}]   ;;  %s2134_s0 = inlined_call_operand.vmem [shape: bf16[512,128], index: 0, kind: input, shape index: {}]   ;;  %s2135_s2 = inlined_call_operand.vmem [shape: bf16[512,128], index: 2, kind: output, shape index: {0}]   ;;  %s2136_s3 = inlined_call_operand.vmem [shape: f32[8,128], index: 3, kind: output, shape index: {1}]   ;;  %s2137_s4 = inlined_call_operand.vmem [shape: f32[8,128], index: 4, kind: output, shape index: {2}]  }
   0x1   :  { %v1654_v0 = vld [vmem:[%s2133_s1 + $0x38] sm:$0xff]   ;;  %v1655_v1 = vld [vmem:[%s2133_s1 + $0x30] sm:$0xff]   ;;  %v1656_v2 = vld [vmem:[%s2133_s1 + $0x28] sm:$0xff]  }
   0x2   :  { %1557 = vmatprep.subr.bf16.mxu0 %v1654_v0  ;;  %1637 = vmatprep.subr.bf16.mxu1 %v1654_v0  ;;  %v1657_v3 = vld [vmem:[%s2133_s1 + $0x20] sm:$0xff]   ;;  %v1658_v5 = vld [vmem:[%s2133_s1 + $0x18] sm:$0xff]   ;;  %v1659_v6 = vld [vmem:[%s2133_s1 + $0x10] sm:$0xff]  }
   0x3   :  { %1558 = vmatpush3.bf16.msra.mxu0 %v1654_v0  ;;  %1645 = vmatpush3.bf16.msra.mxu1 %v1654_v0  ;;  %v1662_v4 = vld [vmem:[%s2134_s0] sm:$0xff]   ;;  %v1660_v7 = vld [vmem:[%s2133_s1 + $0x8] sm:$0xff]   ;;  %v1664_v11 = vld [vmem:[%s2134_s0 + $0x10] sm:$0xff]  }
   0x4   :  { %1559 = vmatprep.subr.bf16.mxu0 %v1655_v1  ;;  %1638 = vmatprep.subr.bf16.mxu1 %v1655_v1  ;;  %v1661_v8 = vld [vmem:[%s2133_s1] sm:$0xff]   ;;  %v1663_v10 = vld [vmem:[%s2134_s0 + $0x8] sm:$0xff]   ;;  %v1680_v13 = vld [vmem:[%s2134_s0 + $0x90] sm:$0xff]  }
   0x5   :  { %1573 = vmatprep.mubr.bf16.mxu0 %v1662_v4  ;;  %v1678_v9 = vld [vmem:[%s2134_s0 + $0x80] sm:$0xff]   ;;  %v1679_v12 = vld [vmem:[%s2134_s0 + $0x88] sm:$0xff]   ;;  %v1665_v14 = vld [vmem:[%s2134_s0 + $0x18] sm:$0xff]  }
   0x6   :  { %1605 = vmatprep.mubr.bf16.mxu1 %v1678_v9  ;;  %v1666_v15 = vld [vmem:[%s2134_s0 + $0x20] sm:$0xff]   ;;  %v1681_v16 = vld [vmem:[%s2134_s0 + $0x98] sm:$0xff]   ;;  %v1667_v18 = vld [vmem:[%s2134_s0 + $0x28] sm:$0xff]  }
   0x7   :  { %1560 = vmatpush3.bf16.msra.mxu0 %v1655_v1  ;;  %1646 = vmatpush3.bf16.msra.mxu1 %v1655_v1  ;;  %v1682_v17 = vld [vmem:[%s2134_s0 + $0xa0] sm:$0xff]   ;;  %v1683_v19 = vld [vmem:[%s2134_s0 + $0xa8] sm:$0xff]   ;;  %v1668_v20 = vld [vmem:[%s2134_s0 + $0x30] sm:$0xff]  }
   0x8   :  { %1561 = vmatprep.subr.bf16.mxu0 %v1656_v2  ;;  %1639 = vmatprep.subr.bf16.mxu1 %v1656_v2  ;;  %v1684_v21 = vld [vmem:[%s2134_s0 + $0xb0] sm:$0xff]   ;;  %v1669_v22 = vld [vmem:[%s2134_s0 + $0x38] sm:$0xff]   ;;  %v1670_v24 = vld [vmem:[%s2134_s0 + $0x40] sm:$0xff]  }
   0x9   :  { %v1685_v23 = vld [vmem:[%s2134_s0 + $0xb8] sm:$0xff]   ;;  %v1686_v25 = vld [vmem:[%s2134_s0 + $0xc0] sm:$0xff]   ;;  %v1671_v26 = vld [vmem:[%s2134_s0 + $0x48] sm:$0xff]  }
   0xa   :  { %v1687_v27 = vld [vmem:[%s2134_s0 + $0xc8] sm:$0xff]   ;;  %v1672_v28 = vld [vmem:[%s2134_s0 + $0x50] sm:$0xff]   ;;  %v1673_v30 = vld [vmem:[%s2134_s0 + $0x58] sm:$0xff]  }
   0xb   :  { %1562 = vmatpush3.bf16.msra.mxu0 %v1656_v2  ;;  %1647 = vmatpush3.bf16.msra.mxu1 %v1656_v2  ;;  %v1688_v29 = vld [vmem:[%s2134_s0 + $0xd0] sm:$0xff]   ;;  %v1689_v31 = vld [vmem:[%s2134_s0 + $0xd8] sm:$0xff]   ;;  %v1674_v32 = vld [vmem:[%s2134_s0 + $0x60] sm:$0xff]  }
   0xc   :  { %1563 = vmatprep.subr.bf16.mxu0 %v1657_v3  ;;  %1640 = vmatprep.subr.bf16.mxu1 %v1657_v3  ;;  %v1690_v33 = vld [vmem:[%s2134_s0 + $0xe0] sm:$0xff]   ;;  %v1675_v34 = vld [vmem:[%s2134_s0 + $0x68] sm:$0xff]   ;;  %v1676_v36 = vld [vmem:[%s2134_s0 + $0x70] sm:$0xff]  }
   0xd   :  { %v1691_v35 = vld [vmem:[%s2134_s0 + $0xe8] sm:$0xff]   ;;  %v1692_v37 = vld [vmem:[%s2134_s0 + $0xf0] sm:$0xff]   ;;  %v1677_v38 = vld [vmem:[%s2134_s0 + $0x78] sm:$0xff]  }
   0xe   :  { %v1693_v39 = vld [vmem:[%s2134_s0 + $0xf8] sm:$0xff]  }
   0xf   :  { %1564 = vmatpush3.bf16.msra.mxu0 %v1657_v3  ;;  %1648 = vmatpush3.bf16.msra.mxu1 %v1657_v3 }
  0x10   :  { %1565 = vmatprep.subr.bf16.mxu0 %v1658_v5  ;;  %1641 = vmatprep.subr.bf16.mxu1 %v1658_v5 }
  0x13   :  { %1566 = vmatpush3.bf16.msra.mxu0 %v1658_v5  ;;  %1649 = vmatpush3.bf16.msra.mxu1 %v1658_v5 }
  0x14   :  { %1567 = vmatprep.subr.bf16.mxu0 %v1659_v6  ;;  %1642 = vmatprep.subr.bf16.mxu1 %v1659_v6 }
  0x17   :  { %1568 = vmatpush3.bf16.msra.mxu0 %v1659_v6  ;;  %1650 = vmatpush3.bf16.msra.mxu1 %v1659_v6 }
  0x18   :  { %1569 = vmatprep.subr.bf16.mxu0 %v1660_v7  ;;  %1643 = vmatprep.subr.bf16.mxu1 %v1660_v7 }
  0x1b   :  { %1570 = vmatpush3.bf16.msra.mxu0 %v1660_v7  ;;  %1651 = vmatpush3.bf16.msra.mxu1 %v1660_v7 }
  0x1c   :  { %1571 = vmatprep.subr.bf16.mxu0 %v1661_v8  ;;  %1644 = vmatprep.subr.bf16.mxu1 %v1661_v8 }
  0x1f   :  { %1572 = vmatpush3.bf16.msra.mxu0 %v1661_v8  ;;  %1652 = vmatpush3.bf16.msra.mxu1 %v1661_v8 }
  0x22   :  { %1574 = vmatmul.mubr.bf16.vlgmr.msra.gmra.mxu0 %v1663_v10  ;;  %1606 = vmatmul.mubr.bf16.vlgmr.msra.gmra.mxu1 %v1679_v12 }
  0x23   :  { %1577 = vmatprep.mubr.bf16.mxu0 %v1664_v11  ;;  %1609 = vmatprep.mubr.bf16.mxu1 %v1680_v13 }
  0x2a   :  { %1578 = vmatmul.mubr.bf16.gmra.mxu0 %v1665_v14  ;;  %1610 = vmatmul.mubr.bf16.gmra.mxu1 %v1681_v16 }
  0x2b   :  { %1581 = vmatprep.mubr.bf16.mxu0 %v1666_v15  ;;  %1613 = vmatprep.mubr.bf16.mxu1 %v1682_v17 }
  0x32   :  { %1582 = vmatmul.mubr.bf16.gmra.mxu0 %v1667_v18  ;;  %1614 = vmatmul.mubr.bf16.gmra.mxu1 %v1683_v19 }
  0x33   :  { %1585 = vmatprep.mubr.bf16.mxu0 %v1668_v20  ;;  %1617 = vmatprep.mubr.bf16.mxu1 %v1684_v21 }
  0x3a   :  { %1586 = vmatmul.mubr.bf16.gmra.mxu0 %v1669_v22  ;;  %1618 = vmatmul.mubr.bf16.gmra.mxu1 %v1685_v23 }
  0x3b   :  { %1589 = vmatprep.mubr.bf16.mxu0 %v1670_v24  ;;  %1621 = vmatprep.mubr.bf16.mxu1 %v1686_v25 }
  0x42   :  { %1590 = vmatmul.mubr.bf16.gmra.mxu0 %v1671_v26  ;;  %1622 = vmatmul.mubr.bf16.gmra.mxu1 %v1687_v27 }
  0x43   :  { %1593 = vmatprep.mubr.bf16.mxu0 %v1672_v28  ;;  %1625 = vmatprep.mubr.bf16.mxu1 %v1688_v29 }
  0x4a   :  { %1594 = vmatmul.mubr.bf16.gmra.mxu0 %v1673_v30  ;;  %1626 = vmatmul.mubr.bf16.gmra.mxu1 %v1689_v31 }
  0x4b   :  { %1597 = vmatprep.mubr.bf16.mxu0 %v1674_v32  ;;  %1629 = vmatprep.mubr.bf16.mxu1 %v1690_v33 }
  0x52   :  { %1598 = vmatmul.mubr.bf16.gmra.mxu0 %v1675_v34  ;;  %1630 = vmatmul.mubr.bf16.gmra.mxu1 %v1691_v35 }
  0x53   :  { %1601 = vmatprep.mubr.bf16.mxu0 %v1676_v36  ;;  %1633 = vmatprep.mubr.bf16.mxu1 %v1692_v37 }
  0x5a   :  { %1602 = vmatmul.mubr.bf16.gmra.mxu0 %v1677_v38  ;;  %1634 = vmatmul.mubr.bf16.gmra.mxu1 %v1693_v39 }
  0xe2   :  { %v1575_v40 = vpop.f32.mrf.mxu0  ;;  %v1839_v41 = vpop.f32.mrf.mxu1 }
  0xe3   :  { %v1019_v57 = vmul.f32 %v1575_v40, %v1575_v40 }
  0xe4   :  { %v375_v42 = vpop.f32.mrf.mxu0  ;;  %v1841_v43 = vpop.f32.mrf.mxu1 }
  0xe5   :  { %v1017_v48 = vmul.f32 %v375_v42, %v375_v42 }
  0xe6   :  { %v1576_v44 = vpop.f32.mrf.mxu0  ;;  %v1843_v45 = vpop.f32.mrf.mxu1 }
  0xe7   :  { %v1334_v46 = vpack.c.bf16 %v1576_v44, %v1575_v40  ;;  %v1414_v47 = vpack.c.bf16 %v1843_v45, %v1839_v41  ;;  %v1020_v62 = vmul.f32 %v1576_v44, %v1576_v44 }
  0xe8   :  { %v378_v49 = vpop.f32.mrf.mxu0  ;;  %v1847_v50 = vpop.f32.mrf.mxu1 }
  0xe9   :  { %1486 = vst [vmem:[%s2135_s2 + $0x8] sm:$0xff] %v1334_v46   ;;  %v1329_v51 = vpack.c.bf16 %v378_v49, %v375_v42  ;;  %v951_v52 = vadd.f32 %v378_v49, %v375_v42  ;;  %v1018_v53 = vmul.f32 %v378_v49, %v378_v49  ;;  %1502 = vst [vmem:[%s2135_s2 + $0x88] sm:$0xff] %v1414_v47  }
  0xea   :  { %v1409_v54 = vpack.c.bf16 %v1847_v50, %v1841_v43  ;;  %v1579_v55 = vpop.f32.mrf.mxu0  ;;  %v1857_v56 = vpop.f32.mrf.mxu1 }
  0xeb   :  { %1330 = vst [vmem:[%s2135_s2] sm:$0xff] %v1329_v51   ;;  %v952_v58 = vadd.f32 %v1575_v40, %v951_v52  ;;  %v1081_v59 = vadd.f32 %v1018_v53, %v1017_v48  ;;  %v1023_v17 = vmul.f32 %v1579_v55, %v1579_v55 }
  0xec   :  { %1501 = vst [vmem:[%s2135_s2 + $0x80] sm:$0xff] %v1409_v54   ;;  %v391_v60 = vpop.f32.mrf.mxu0  ;;  %v1865_v61 = vpop.f32.mrf.mxu1 }
  0xed   :  { %v1082_v63 = vadd.f32 %v1081_v59, %v1019_v57  ;;  %v953_v0 = vadd.f32 %v1576_v44, %v952_v58  ;;  %v1021_v4 = vmul.f32 %v391_v60, %v391_v60 }
  0xee   :  { %v1580_v1 = vpop.f32.mrf.mxu0  ;;  %v1867_v2 = vpop.f32.mrf.mxu1 }
  0xef   :  { %v954_v3 = vadd.f32 %v953_v0, %v391_v60  ;;  %v1083_v5 = vadd.f32 %v1082_v63, %v1020_v62  ;;  %v1344_v6 = vpack.c.bf16 %v1580_v1, %v1579_v55  ;;  %v1424_v8 = vpack.c.bf16 %v1867_v2, %v1857_v56 }
  0xf0   :  { %v394_v7 = vpop.f32.mrf.mxu0  ;;  %v1871_v9 = vpop.f32.mrf.mxu1  ;;  %v1024_v22 = vmul.f32 %v1580_v1, %v1580_v1 }
  0xf1   :  { %v1084_v10 = vadd.f32 %v1083_v5, %v1021_v4  ;;  %1488 = vst [vmem:[%s2135_s2 + $0x18] sm:$0xff] %v1344_v6   ;;  %v1339_v11 = vpack.c.bf16 %v394_v7, %v391_v60  ;;  %v955_v12 = vadd.f32 %v954_v3, %v394_v7  ;;  %v1022_v13 = vmul.f32 %v394_v7, %v394_v7 }
  0xf2   :  { %v1583_v14 = vpop.f32.mrf.mxu0  ;;  %1504 = vst [vmem:[%s2135_s2 + $0x98] sm:$0xff] %v1424_v8   ;;  %v1419_v15 = vpack.c.bf16 %v1871_v9, %v1865_v61  ;;  %v1881_v16 = vpop.f32.mrf.mxu1 }
  0xf3   :  { %1487 = vst [vmem:[%s2135_s2 + $0x10] sm:$0xff] %v1339_v11   ;;  %v956_v18 = vadd.f32 %v1579_v55, %v955_v12  ;;  %v1085_v19 = vadd.f32 %v1084_v10, %v1022_v13  ;;  %v1027_v42 = vmul.f32 %v1583_v14, %v1583_v14 }
  0xf4   :  { %v407_v20 = vpop.f32.mrf.mxu0  ;;  %1503 = vst [vmem:[%s2135_s2 + $0x90] sm:$0xff] %v1419_v15   ;;  %v1889_v21 = vpop.f32.mrf.mxu1 }
  0xf5   :  { %v1086_v23 = vadd.f32 %v1085_v19, %v1023_v17  ;;  %v957_v24 = vadd.f32 %v1580_v1, %v956_v18  ;;  %v1025_v28 = vmul.f32 %v407_v20, %v407_v20 }
  0xf6   :  { %v1584_v25 = vpop.f32.mrf.mxu0  ;;  %v1891_v26 = vpop.f32.mrf.mxu1 }
  0xf7   :  { %v958_v27 = vadd.f32 %v957_v24, %v407_v20  ;;  %v1087_v29 = vadd.f32 %v1086_v23, %v1024_v22  ;;  %v1354_v30 = vpack.c.bf16 %v1584_v25, %v1583_v14  ;;  %v1434_v32 = vpack.c.bf16 %v1891_v26, %v1881_v16 }
  0xf8   :  { %v410_v31 = vpop.f32.mrf.mxu0  ;;  %v1895_v33 = vpop.f32.mrf.mxu1  ;;  %v1028_v49 = vmul.f32 %v1584_v25, %v1584_v25 }
  0xf9   :  { %v1088_v34 = vadd.f32 %v1087_v29, %v1025_v28  ;;  %1490 = vst [vmem:[%s2135_s2 + $0x28] sm:$0xff] %v1354_v30   ;;  %v1349_v35 = vpack.c.bf16 %v410_v31, %v407_v20  ;;  %v959_v36 = vadd.f32 %v958_v27, %v410_v31  ;;  %v1026_v37 = vmul.f32 %v410_v31, %v410_v31 }
  0xfa   :  { %v1587_v38 = vpop.f32.mrf.mxu0  ;;  %1506 = vst [vmem:[%s2135_s2 + $0xa8] sm:$0xff] %v1434_v32   ;;  %v1429_v39 = vpack.c.bf16 %v1895_v33, %v1889_v21  ;;  %v1905_v40 = vpop.f32.mrf.mxu1 }
  0xfb   :  { %1489 = vst [vmem:[%s2135_s2 + $0x20] sm:$0xff] %v1349_v35   ;;  %v960_v44 = vadd.f32 %v1583_v14, %v959_v36  ;;  %v1089_v46 = vadd.f32 %v1088_v34, %v1026_v37  ;;  %v1031_v8 = vmul.f32 %v1587_v38, %v1587_v38 }
  0xfc   :  { %v423_v47 = vpop.f32.mrf.mxu0  ;;  %1505 = vst [vmem:[%s2135_s2 + $0xa0] sm:$0xff] %v1429_v39   ;;  %v1913_v48 = vpop.f32.mrf.mxu1 }
  0xfd   :  { %v1090_v51 = vadd.f32 %v1089_v46, %v1027_v42  ;;  %v961_v52 = vadd.f32 %v1584_v25, %v960_v44  ;;  %v1029_v57 = vmul.f32 %v423_v47, %v423_v47 }
  0xfe   :  { %v1588_v53 = vpop.f32.mrf.mxu0  ;;  %v1915_v54 = vpop.f32.mrf.mxu1 }
  0xff   :  { %v962_v55 = vadd.f32 %v961_v52, %v423_v47  ;;  %v1091_v58 = vadd.f32 %v1090_v51, %v1028_v49  ;;  %v1364_v59 = vpack.c.bf16 %v1588_v53, %v1587_v38  ;;  %v1444_v62 = vpack.c.bf16 %v1915_v54, %v1905_v40 }
 0x100   :  { %v426_v60 = vpop.f32.mrf.mxu0  ;;  %v1919_v63 = vpop.f32.mrf.mxu1  ;;  %v1032_v14 = vmul.f32 %v1588_v53, %v1588_v53 }
 0x101   :  { %v1092_v0 = vadd.f32 %v1091_v58, %v1029_v57  ;;  %1492 = vst [vmem:[%s2135_s2 + $0x38] sm:$0xff] %v1364_v59   ;;  %v1359_v1 = vpack.c.bf16 %v426_v60, %v423_v47  ;;  %v963_v3 = vadd.f32 %v962_v55, %v426_v60  ;;  %v1030_v4 = vmul.f32 %v426_v60, %v426_v60 }
 0x102   :  { %v1591_v5 = vpop.f32.mrf.mxu0  ;;  %1508 = vst [vmem:[%s2135_s2 + $0xb8] sm:$0xff] %v1444_v62   ;;  %v1439_v6 = vpack.c.bf16 %v1919_v63, %v1913_v48  ;;  %v1929_v7 = vpop.f32.mrf.mxu1 }
 0x103   :  { %1491 = vst [vmem:[%s2135_s2 + $0x30] sm:$0xff] %v1359_v1   ;;  %v964_v10 = vadd.f32 %v1587_v38, %v963_v3  ;;  %v1093_v11 = vadd.f32 %v1092_v0, %v1030_v4  ;;  %v1035_v37 = vmul.f32 %v1591_v5, %v1591_v5 }
 0x104   :  { %v439_v12 = vpop.f32.mrf.mxu0  ;;  %1507 = vst [vmem:[%s2135_s2 + $0xb0] sm:$0xff] %v1439_v6   ;;  %v1937_v13 = vpop.f32.mrf.mxu1 }
 0x105   :  { %v1094_v15 = vadd.f32 %v1093_v11, %v1031_v8  ;;  %v965_v17 = vadd.f32 %v1588_v53, %v964_v10  ;;  %v1033_v22 = vmul.f32 %v439_v12, %v439_v12 }
 0x106   :  { %v1592_v18 = vpop.f32.mrf.mxu0  ;;  %v1939_v19 = vpop.f32.mrf.mxu1 }
 0x107   :  { %v966_v20 = vadd.f32 %v965_v17, %v439_v12  ;;  %v1095_v23 = vadd.f32 %v1094_v15, %v1032_v14  ;;  %v1374_v24 = vpack.c.bf16 %v1592_v18, %v1591_v5  ;;  %v1454_v27 = vpack.c.bf16 %v1939_v19, %v1929_v7 }
 0x108   :  { %v442_v25 = vpop.f32.mrf.mxu0  ;;  %v1943_v28 = vpop.f32.mrf.mxu1  ;;  %v1036_v46 = vmul.f32 %v1592_v18, %v1592_v18 }
 0x109   :  { %v1096_v29 = vadd.f32 %v1095_v23, %v1033_v22  ;;  %1494 = vst [vmem:[%s2135_s2 + $0x48] sm:$0xff] %v1374_v24   ;;  %v1369_v30 = vpack.c.bf16 %v442_v25, %v439_v12  ;;  %v967_v31 = vadd.f32 %v966_v20, %v442_v25  ;;  %v1034_v32 = vmul.f32 %v442_v25, %v442_v25 }
 0x10a   :  { %v1595_v34 = vpop.f32.mrf.mxu0  ;;  %1510 = vst [vmem:[%s2135_s2 + $0xc8] sm:$0xff] %v1454_v27   ;;  %v1449_v35 = vpack.c.bf16 %v1943_v28, %v1937_v13  ;;  %v1953_v36 = vpop.f32.mrf.mxu1 }
 0x10b   :  { %1493 = vst [vmem:[%s2135_s2 + $0x40] sm:$0xff] %v1369_v30   ;;  %v968_v38 = vadd.f32 %v1591_v5, %v967_v31  ;;  %v1097_v39 = vadd.f32 %v1096_v29, %v1034_v32  ;;  %v1039_v10 = vmul.f32 %v1595_v34, %v1595_v34 }
 0x10c   :  { %v455_v42 = vpop.f32.mrf.mxu0  ;;  %1509 = vst [vmem:[%s2135_s2 + $0xc0] sm:$0xff] %v1449_v35   ;;  %v1961_v44 = vpop.f32.mrf.mxu1 }
 0x10d   :  { %v1098_v47 = vadd.f32 %v1097_v39, %v1035_v37  ;;  %v969_v49 = vadd.f32 %v1592_v18, %v968_v38  ;;  %v1037_v55 = vmul.f32 %v455_v42, %v455_v42 }
 0x10e   :  { %v1596_v51 = vpop.f32.mrf.mxu0  ;;  %v1963_v52 = vpop.f32.mrf.mxu1 }
 0x10f   :  { %v970_v53 = vadd.f32 %v969_v49, %v455_v42  ;;  %v1099_v57 = vadd.f32 %v1098_v47, %v1036_v46  ;;  %v1384_v58 = vpack.c.bf16 %v1596_v51, %v1595_v34  ;;  %v1464_v60 = vpack.c.bf16 %v1963_v52, %v1953_v36 }
 0x110   :  { %v458_v59 = vpop.f32.mrf.mxu0  ;;  %v1967_v62 = vpop.f32.mrf.mxu1  ;;  %v1040_v17 = vmul.f32 %v1596_v51, %v1596_v51 }
 0x111   :  { %v1100_v0 = vadd.f32 %v1099_v57, %v1037_v55  ;;  %1496 = vst [vmem:[%s2135_s2 + $0x58] sm:$0xff] %v1384_v58   ;;  %v1379_v1 = vpack.c.bf16 %v458_v59, %v455_v42  ;;  %v971_v3 = vadd.f32 %v970_v53, %v458_v59  ;;  %v1038_v4 = vmul.f32 %v458_v59, %v458_v59 }
 0x112   :  { %v1599_v5 = vpop.f32.mrf.mxu0  ;;  %1512 = vst [vmem:[%s2135_s2 + $0xd8] sm:$0xff] %v1464_v60   ;;  %v1459_v6 = vpack.c.bf16 %v1967_v62, %v1961_v44  ;;  %v1977_v8 = vpop.f32.mrf.mxu1 }
 0x113   :  { %1495 = vst [vmem:[%s2135_s2 + $0x50] sm:$0xff] %v1379_v1   ;;  %v972_v11 = vadd.f32 %v1595_v34, %v971_v3  ;;  %v1101_v12 = vadd.f32 %v1100_v0, %v1038_v4  ;;  %v1043_v47 = vmul.f32 %v1599_v5, %v1599_v5 }
 0x114   :  { %v471_v14 = vpop.f32.mrf.mxu0  ;;  %1511 = vst [vmem:[%s2135_s2 + $0xd0] sm:$0xff] %v1459_v6   ;;  %v1985_v15 = vpop.f32.mrf.mxu1 }
 0x115   :  { %v1102_v18 = vadd.f32 %v1101_v12, %v1039_v10  ;;  %v973_v20 = vadd.f32 %v1596_v51, %v972_v11  ;;  %v1041_v25 = vmul.f32 %v471_v14, %v471_v14 }
 0x116   :  { %v1600_v22 = vpop.f32.mrf.mxu0  ;;  %v1987_v23 = vpop.f32.mrf.mxu1 }
 0x117   :  { %v974_v24 = vadd.f32 %v973_v20, %v471_v14  ;;  %v1103_v27 = vadd.f32 %v1102_v18, %v1040_v17  ;;  %v1394_v29 = vpack.c.bf16 %v1600_v22, %v1599_v5  ;;  %v1474_v31 = vpack.c.bf16 %v1987_v23, %v1977_v8 }
 0x118   :  { %v474_v30 = vpop.f32.mrf.mxu0  ;;  %v1991_v32 = vpop.f32.mrf.mxu1  ;;  %v1044_v57 = vmul.f32 %v1600_v22, %v1600_v22 }
 0x119   :  { %v1104_v34 = vadd.f32 %v1103_v27, %v1041_v25  ;;  %1498 = vst [vmem:[%s2135_s2 + $0x68] sm:$0xff] %v1394_v29   ;;  %v1389_v35 = vpack.c.bf16 %v474_v30, %v471_v14  ;;  %v975_v37 = vadd.f32 %v974_v24, %v474_v30  ;;  %v1042_v38 = vmul.f32 %v474_v30, %v474_v30 }
 0x11a   :  { %v1603_v39 = vpop.f32.mrf.mxu0  ;;  %1514 = vst [vmem:[%s2135_s2 + $0xe8] sm:$0xff] %v1474_v31   ;;  %v1469_v42 = vpack.c.bf16 %v1991_v32, %v1985_v15  ;;  %v2001_v46 = vpop.f32.mrf.mxu1  ;;  %v1049_v31 = vmul.f32 %v1841_v43, %v1841_v43 }
 0x11b   :  { %1497 = vst [vmem:[%s2135_s2 + $0x60] sm:$0xff] %v1389_v35   ;;  %v976_v49 = vadd.f32 %v1599_v5, %v975_v37  ;;  %v1105_v51 = vadd.f32 %v1104_v34, %v1042_v38  ;;  %v1050_v38 = vmul.f32 %v1847_v50, %v1847_v50 }
 0x11c   :  { %v487_v53 = vpop.f32.mrf.mxu0  ;;  %1513 = vst [vmem:[%s2135_s2 + $0xe0] sm:$0xff] %v1469_v42   ;;  %v2009_v55 = vpop.f32.mrf.mxu1  ;;  %v1051_v42 = vmul.f32 %v1839_v41, %v1839_v41 }
 0x11d   :  { %v1106_v58 = vadd.f32 %v1105_v51, %v1043_v47  ;;  %v977_v59 = vadd.f32 %v1600_v22, %v976_v49  ;;  %v1045_v3 = vmul.f32 %v487_v53, %v487_v53  ;;  %v1047_v22 = vmul.f32 %v1603_v39, %v1603_v39 }
 0x11e   :  { %v1604_v60 = vpop.f32.mrf.mxu0  ;;  %v2011_v0 = vpop.f32.mrf.mxu1  ;;  %v1052_v51 = vmul.f32 %v1843_v45, %v1843_v45 }
 0x11f   :  { %v978_v1 = vadd.f32 %v977_v59, %v487_v53  ;;  %v1107_v4 = vadd.f32 %v1106_v58, %v1044_v57  ;;  %v1404_v6 = vpack.c.bf16 %v1604_v60, %v1603_v39  ;;  %v1484_v5 = vpack.c.bf16 %v2011_v0, %v2001_v46 }
 0x120   :  { %v490_v10 = vpop.f32.mrf.mxu0  ;;  %v2015_v11 = vpop.f32.mrf.mxu1  ;;  %v1048_v27 = vmul.f32 %v1604_v60, %v1604_v60  ;;  %v1053_v58 = vmul.f32 %v1865_v61, %v1865_v61 }
 0x121   :  { %v1108_v12 = vadd.f32 %v1107_v4, %v1045_v3  ;;  %1500 = vst [vmem:[%s2135_s2 + $0x78] sm:$0xff] %v1404_v6   ;;  %v1399_v14 = vpack.c.bf16 %v490_v10, %v487_v53  ;;  %v979_v17 = vadd.f32 %v978_v1, %v490_v10  ;;  %v1046_v18 = vmul.f32 %v490_v10, %v490_v10 }
 0x122   :  { %1516 = vst [vmem:[%s2135_s2 + $0xf8] sm:$0xff] %v1484_v5   ;;  %v1479_v20 = vpack.c.bf16 %v2015_v11, %v2009_v55  ;;  %v1054_v1 = vmul.f32 %v1871_v9, %v1871_v9  ;;  %v1057_v5 = vmul.f32 %v1889_v21, %v1889_v21 }
 0x123   :  { %1499 = vst [vmem:[%s2135_s2 + $0x70] sm:$0xff] %v1399_v14   ;;  %v980_v24 = vadd.f32 %v1603_v39, %v979_v17  ;;  %v1109_v25 = vadd.f32 %v1108_v12, %v1046_v18  ;;  %v1058_v17 = vmul.f32 %v1895_v33, %v1895_v33 }
 0x124   :  { %1515 = vst [vmem:[%s2135_s2 + $0xf0] sm:$0xff] %v1479_v20  }
 0x125   :  { %v981_v29 = vadd.f32 %v1604_v60, %v980_v24  ;;  %v1110_v30 = vadd.f32 %v1109_v25, %v1047_v22  ;;  %v1061_v25 = vmul.f32 %v1913_v48, %v1913_v48 }
 0x127   :  { %v1111_v34 = vadd.f32 %v1110_v30, %v1048_v27  ;;  %v982_v35 = vadd.f32 %v981_v29, %v1841_v43  ;;  %v1062_v30 = vmul.f32 %v1919_v63, %v1919_v63 }
 0x129   :  { %v983_v37 = vadd.f32 %v982_v35, %v1847_v50  ;;  %v1112_v39 = vadd.f32 %v1111_v34, %v1049_v31 }
 0x12b   :  { %v984_v47 = vadd.f32 %v1839_v41, %v983_v37  ;;  %v1113_v49 = vadd.f32 %v1112_v39, %v1050_v38  ;;  %v1055_v41 = vmul.f32 %v1857_v56, %v1857_v56  ;;  %v1065_v38 = vmul.f32 %v1937_v13, %v1937_v13 }
 0x12d   :  { %v1114_v53 = vadd.f32 %v1113_v49, %v1051_v42  ;;  %v985_v57 = vadd.f32 %v1843_v45, %v984_v47  ;;  %v1056_v45 = vmul.f32 %v1867_v2, %v1867_v2  ;;  %v1066_v47 = vmul.f32 %v1943_v28, %v1943_v28 }
 0x12f   :  { %v986_v43 = vadd.f32 %v985_v57, %v1865_v61  ;;  %v1115_v59 = vadd.f32 %v1114_v53, %v1052_v51 }
 0x131   :  { %v1116_v50 = vadd.f32 %v1115_v59, %v1053_v58  ;;  %v987_v60 = vadd.f32 %v986_v43, %v1871_v9  ;;  %v1069_v43 = vmul.f32 %v1961_v44, %v1961_v44 }
 0x133   :  { %v988_v3 = vadd.f32 %v1857_v56, %v987_v60  ;;  %v1117_v4 = vadd.f32 %v1116_v50, %v1054_v1  ;;  %v1059_v56 = vmul.f32 %v1881_v16, %v1881_v16  ;;  %v1070_v50 = vmul.f32 %v1967_v62, %v1967_v62 }
 0x135   :  { %v1118_v6 = vadd.f32 %v1117_v4, %v1055_v41  ;;  %v989_v10 = vadd.f32 %v1867_v2, %v988_v3  ;;  %v1060_v2 = vmul.f32 %v1891_v26, %v1891_v26  ;;  %v1073_v4 = vmul.f32 %v1985_v15, %v1985_v15 }
 0x137   :  { %v990_v61 = vadd.f32 %v989_v10, %v1889_v21  ;;  %v1119_v12 = vadd.f32 %v1118_v6, %v1056_v45  ;;  %v1074_v10 = vmul.f32 %v1991_v32, %v1991_v32 }
 0x139   :  { %v1120_v14 = vadd.f32 %v1119_v12, %v1057_v5  ;;  %v991_v9 = vadd.f32 %v990_v61, %v1895_v33 }
 0x13b   :  { %v992_v18 = vadd.f32 %v1881_v16, %v991_v9  ;;  %v1121_v20 = vadd.f32 %v1120_v14, %v1058_v17  ;;  %v1063_v16 = vmul.f32 %v1905_v40, %v1905_v40  ;;  %v1077_v9 = vmul.f32 %v2009_v55, %v2009_v55 }
 0x13d   :  { %v1122_v22 = vadd.f32 %v1121_v20, %v1059_v56  ;;  %v993_v24 = vadd.f32 %v1891_v26, %v992_v18  ;;  %v1064_v26 = vmul.f32 %v1915_v54, %v1915_v54  ;;  %v1078_v18 = vmul.f32 %v2015_v11, %v2015_v11 }
 0x13f   :  { %v994_v21 = vadd.f32 %v993_v24, %v1913_v48  ;;  %v1123_v27 = vadd.f32 %v1122_v22, %v1060_v2 }
 0x141   :  { %v1124_v29 = vadd.f32 %v1123_v27, %v1061_v25  ;;  %v995_v33 = vadd.f32 %v994_v21, %v1919_v63 }
 0x143   :  { %v996_v31 = vadd.f32 %v1905_v40, %v995_v33  ;;  %v1125_v34 = vadd.f32 %v1124_v29, %v1062_v30  ;;  %v1067_v40 = vmul.f32 %v1929_v7, %v1929_v7 }
 0x145   :  { %v1126_v35 = vadd.f32 %v1125_v34, %v1063_v16  ;;  %v997_v37 = vadd.f32 %v1915_v54, %v996_v31  ;;  %v1068_v54 = vmul.f32 %v1939_v19, %v1939_v19 }
 0x147   :  { %v998_v48 = vadd.f32 %v997_v37, %v1937_v13  ;;  %v1127_v39 = vadd.f32 %v1126_v35, %v1064_v26 }
 0x149   :  { %v1128_v42 = vadd.f32 %v1127_v39, %v1065_v38  ;;  %v999_v63 = vadd.f32 %v998_v48, %v1943_v28 }
 0x14b   :  { %v1000_v49 = vadd.f32 %v1929_v7, %v999_v63  ;;  %v1129_v51 = vadd.f32 %v1128_v42, %v1066_v47  ;;  %v1071_v7 = vmul.f32 %v1953_v36, %v1953_v36 }
 0x14d   :  { %v1130_v53 = vadd.f32 %v1129_v51, %v1067_v40  ;;  %v1001_v57 = vadd.f32 %v1939_v19, %v1000_v49  ;;  %v1072_v19 = vmul.f32 %v1963_v52, %v1963_v52 }
 0x14f   :  { %v1002_v13 = vadd.f32 %v1001_v57, %v1961_v44  ;;  %v1131_v58 = vadd.f32 %v1130_v53, %v1068_v54 }
 0x151   :  { %v1132_v59 = vadd.f32 %v1131_v58, %v1069_v43  ;;  %v1003_v28 = vadd.f32 %v1002_v13, %v1967_v62 }
 0x153   :  { %v1004_v60 = vadd.f32 %v1953_v36, %v1003_v28  ;;  %v1133_v1 = vadd.f32 %v1132_v59, %v1070_v50  ;;  %v1075_v36 = vmul.f32 %v1977_v8, %v1977_v8 }
 0x155   :  { %v1134_v41 = vadd.f32 %v1133_v1, %v1071_v7  ;;  %v1005_v3 = vadd.f32 %v1963_v52, %v1004_v60  ;;  %v1076_v52 = vmul.f32 %v1987_v23, %v1987_v23 }
 0x157   :  { %v1006_v44 = vadd.f32 %v1005_v3, %v1985_v15  ;;  %v1135_v45 = vadd.f32 %v1134_v41, %v1072_v19 }
 0x159   :  { %v1136_v6 = vadd.f32 %v1135_v45, %v1073_v4  ;;  %v1007_v62 = vadd.f32 %v1006_v44, %v1991_v32 }
 0x15b   :  { %v1008_v61 = vadd.f32 %v1977_v8, %v1007_v62  ;;  %v1137_v5 = vadd.f32 %v1136_v6, %v1074_v10  ;;  %v1079_v8 = vmul.f32 %v2001_v46, %v2001_v46 }
 0x15d   :  { %v1138_v12 = vadd.f32 %v1137_v5, %v1075_v36  ;;  %v1009_v14 = vadd.f32 %v1987_v23, %v1008_v61  ;;  %v1080_v23 = vmul.f32 %v2011_v0, %v2011_v0 }
 0x15f   :  { %v1010_v15 = vadd.f32 %v1009_v14, %v2009_v55  ;;  %v1139_v17 = vadd.f32 %v1138_v12, %v1076_v52 }
 0x161   :  { %v1140_v56 = vadd.f32 %v1139_v17, %v1077_v9  ;;  %v1011_v32 = vadd.f32 %v1010_v15, %v2015_v11 }
 0x163   :  { %v1012_v20 = vadd.f32 %v2001_v46, %v1011_v32  ;;  %v1141_v2 = vadd.f32 %v1140_v56, %v1078_v18 }
 0x165   :  { %v1013_v22 = vadd.f32 %v2011_v0, %v1012_v20  ;;  %v1142_v24 = vadd.f32 %v1141_v2, %v1079_v8 }
 0x167   :  { %v1143_v55 = vadd.f32 %v1142_v24, %v1080_v23  ;;  %1015 = vst [vmem:[%s2136_s3] sm:$0xff] %v1013_v22 }
 0x169   :  { %1145 = vst [vmem:[%s2137_s4] sm:$0xff] %v1143_v55 }

</bundles_post_ra>
